<compile_context>
chip_gen: v5e
topology: v5e:2x2
jax: 0.10.0
libtpu: 0.0.40
codegen_flags: <defaults>
</compile_context>

<pallas_src>
import functools

import jax
import jax.numpy as jnp
from jax import lax
from jax.experimental import pallas as pl
from jax.experimental.pallas import tpu as pltpu


# ----------------------------------------------------------------------------
# Synthetic, scaled-down HiFi-GAN-MSD-style config (module's `config`).
# ----------------------------------------------------------------------------
class config:
    msd_kernels = [5, 7, 7, 5]
    msd_strides = [1, 2, 2, 1]
    msd_in_channels = [1, 8, 16, 16]
    msd_out_channels = [8, 16, 16, 16]
    msd_groups = [1, 2, 4, 1]
    leaky_relu = 0.1
    msd_out_kernel = 3


def _layer_descs(l_in0):
    """Static geometry of all 5 layers (4 blocks + out_conv), torch Conv1d rules."""
    ks = list(config.msd_kernels) + [config.msd_out_kernel]
    ss = list(config.msd_strides) + [1]
    cis = list(config.msd_in_channels) + [config.msd_out_channels[-1]]
    cos = list(config.msd_out_channels) + [1]
    # NOTE: out_conv uses padding=msd_out_kernel (not k//2) — mirrors the
    # PyTorch module exactly as written.
    pads = [k // 2 for k in config.msd_kernels] + [config.msd_out_kernel]
    gs = list(config.msd_groups) + [1]
    acts = [True] * len(config.msd_kernels) + [False]

    descs = []
    l = l_in0
    for k, s, ci, co, p, g, a in zip(ks, ss, cis, cos, pads, gs, acts):
        l_full = l + 2 * p - k + 1           # stride-1 output length
        l_out = (l + 2 * p - k) // s + 1     # strided output length
        descs.append(dict(c_in=ci, c_out=co, ksize=k, stride=s, pad=p,
                          groups=g, l_in=l, l_full=l_full, l_out=l_out, act=a))
        l = l_out
    return descs


# ----------------------------------------------------------------------------
# Fused Pallas kernel: all 5 conv layers, intermediates resident in VMEM.
# ----------------------------------------------------------------------------
def _sub_msd_kernel(*refs, descs, slope):
    n_layers = len(descs)
    x_ref = refs[0]
    w_refs = [refs[1 + 2 * i] for i in range(n_layers)]
    b_refs = [refs[2 + 2 * i] for i in range(n_layers)]
    f_refs = list(refs[1 + 2 * n_layers:1 + 3 * n_layers])
    xc_refs = list(refs[1 + 3 * n_layers:])

    y = x_ref[0, :, :]                       # (C_in0, L0)  -- NCL orientation
    for i, d in enumerate(descs):
        c_in, ksize, pad = d["c_in"], d["ksize"], d["pad"]
        l_in, l_full, l_out = d["l_in"], d["l_full"], d["l_out"]
        stride = d["stride"]
        xc = xc_refs[i]

        # ---- im2col into VMEM scratch; implicit zero padding along L. ------
        # Row block k, column j holds x_pad[:, j + k] (x_pad = zero-padded y).
        xc[...] = jnp.zeros(xc.shape, xc.dtype)
        for k in range(ksize):               # static Python unroll
            dst0 = max(0, pad - k)
            dst1 = min(l_full, l_in + pad - k)
            src0 = dst0 + k - pad
            xc[k * c_in:(k + 1) * c_in, dst0:dst1] = \
                y[:, src0:src0 + (dst1 - dst0)]

        # ---- ONE matmul per layer: (C_out, K*C_in) @ (K*C_in, L_full). ------
        acc = jnp.dot(w_refs[i][...], xc[...],
                      preferred_element_type=jnp.float32,
                      precision=lax.Precision.HIGHEST)

        # ---- stride > 1: exact 0/1 column-selection matmul (no strided refs).
        if stride > 1:
            jj = lax.broadcasted_iota(jnp.int32, (l_full, l_out), 0)
            ii = lax.broadcasted_iota(jnp.int32, (l_full, l_out), 1)
            sel = (jj == stride * ii).astype(jnp.float32)
            acc = jnp.dot(acc, sel, preferred_element_type=jnp.float32,
                          precision=lax.Precision.HIGHEST)     # (C_out, L_out)

        acc = acc + b_refs[i][...]                    # (C_out, 1) lane-broadcast
        if d["act"]:
            acc = jnp.where(acc >= 0, acc, slope * acc)        # LeakyReLU

        f_refs[i][0, :, :] = acc.astype(f_refs[i].dtype)       # full-width NCL store
        y = acc                                                 # stays in vregs/VMEM


# ----------------------------------------------------------------------------
# Wrapper: block-diagonal weight flattening + single pallas_call.
# ----------------------------------------------------------------------------
def _flatten_conv_weight(weight, groups):
    """(C_out, C_in/groups, K) torch weight -> block-diagonal (C_out, K*C_in).

    W_flat[co, k*C_in + ci] = weight[co, ci - g*cin_pg, k] if ci, co share a
    group, else 0.  Built with an exact 0/1 elementwise mask (no matmul)."""
    c_out, cin_pg, ksize = weight.shape
    cout_pg = c_out // groups
    c_in = cin_pg * groups
    wt = jnp.transpose(weight.reshape(groups, cout_pg, cin_pg, ksize),
                       (0, 1, 3, 2))                          # [g, o, k, i]
    eye = jnp.eye(groups, dtype=weight.dtype)
    blocks = wt[:, :, :, None, :] * eye[:, None, None, :, None]  # [g,o,k,h,i]
    return blocks.reshape(c_out, ksize * c_in)


@jax.jit
def sub_msd_forward(x_ncl, params):
    """SubMSD forward. x_ncl: (N, C, L) like PyTorch Conv1d input."""
    n, c_in0, l_in0 = x_ncl.shape
    descs = _layer_descs(l_in0)
    blocks_n = len(config.msd_kernels)

    operands = [x_ncl]
    in_specs = [pl.BlockSpec((1, c_in0, l_in0), lambda i: (i, 0, 0))]
    for li, d in enumerate(descs):
        w, b = params["convs"][li] if li < blocks_n else params["out_conv"]
        operands.append(_flatten_conv_weight(w, d["groups"]))
        operands.append(b.reshape(d["c_out"], 1))
        in_specs.append(pl.BlockSpec((d["c_out"], d["ksize"] * d["c_in"]),
                                     lambda i: (0, 0)))
        in_specs.append(pl.BlockSpec((d["c_out"], 1), lambda i: (0, 0)))

    out_shape = tuple(
        jax.ShapeDtypeStruct((n, d["c_out"], d["l_out"]), x_ncl.dtype)
        for d in descs)
    out_specs = tuple(
        pl.BlockSpec((1, d["c_out"], d["l_out"]), lambda i: (i, 0, 0))
        for d in descs)
    scratch_shapes = [
        pltpu.VMEM((d["ksize"] * d["c_in"], d["l_full"]), jnp.float32)
        for d in descs]

    kernel = functools.partial(_sub_msd_kernel, descs=descs,
                               slope=config.leaky_relu)

    feats = pl.pallas_call(
        kernel,
        out_shape=out_shape,
        grid=(n,),
        in_specs=in_specs,
        out_specs=out_specs,
        scratch_shapes=scratch_shapes,
        compiler_params=pltpu.CompilerParams(
            dimension_semantics=("parallel",)),
    )(*operands)

    features = list(feats)                    # already NCL, like torch features
    output = feats[-1].reshape(n, -1)         # torch.flatten(output, 1, -1)
    return output, features


# ----------------------------------------------------------------------------
# Parameter init (weight_norm reparameterization, deterministic).
# ----------------------------------------------------------------------------
def _init_wn_conv(key, c_out, cin_pg, ksize):
    k1, k2, k3 = jax.random.split(key, 3)
    fan_in = cin_pg * ksize
    bound = 1.0 / jnp.sqrt(jnp.float32(fan_in))
    v = jax.random.uniform(k1, (c_out, cin_pg, ksize), jnp.float32, -bound, bound)
    g = jax.random.uniform(k2, (c_out,), jnp.float32, 0.5, 1.5)
    b = jax.random.uniform(k3, (c_out,), jnp.float32, -bound, bound)
    norm = jnp.sqrt(jnp.sum(v * v, axis=(1, 2), keepdims=True))
    w = g[:, None, None] * v / norm           # effective weight_norm weight
    return w, b


def init_sub_msd_params(key, spectral=False):
    del spectral  # weight_norm branch only (see TODO at top)
    blocks_n = len(config.msd_kernels)
    keys = jax.random.split(key, blocks_n + 1)
    convs = []
    for i in range(blocks_n):
        cin_pg = config.msd_in_channels[i] // config.msd_groups[i]
        convs.append(_init_wn_conv(keys[i], config.msd_out_channels[i],
                                   cin_pg, config.msd_kernels[i]))
    out_conv = _init_wn_conv(keys[-1], 1, config.msd_out_channels[-1],
                             config.msd_out_kernel)
    return {"convs": convs, "out_conv": out_conv}


# ----------------------------------------------------------------------------
# Pure-JAX reference (verification only).
# ----------------------------------------------------------------------------
def _conv1d_ref(x_ncl, w, b, stride, padding, groups, apply_act, slope):
    y = lax.conv_general_dilated(
        x_ncl, w, (stride,), [(padding, padding)],
        dimension_numbers=("NCH", "OIH", "NCH"),
        feature_group_count=groups,
        precision=lax.Precision.HIGHEST)
    y = y + b[None, :, None]
    if apply_act:
        y = jnp.where(y >= 0, y, slope * y)
    return y


def sub_msd_forward_ref(x_ncl, params):
    blocks_n = len(config.msd_kernels)
    x = x_ncl
    features = []
    for i in range(blocks_n):
        w, b = params["convs"][i]
        x = _conv1d_ref(x, w, b, config.msd_strides[i],
                        config.msd_kernels[i] // 2, config.msd_groups[i],
                        True, config.leaky_relu)
        features.append(x)
    w, b = params["out_conv"]
    x = _conv1d_ref(x, w, b, 1, config.msd_out_kernel, 1, False, 0.0)
    features.append(x)
    return x.reshape(x.shape[0], -1), features


# ----------------------------------------------------------------------------
if __name__ == "__main__":
    root = jax.random.PRNGKey(0)
    k_in, k_par = jax.random.split(root)

    # PyTorch-style Conv1d input: (N, C, L)
    x = jax.random.normal(k_in, (2, config.msd_in_channels[0], 64), jnp.float32)
    params = init_sub_msd_params(k_par, spectral=False)

    out, feats = sub_msd_forward(x, params)
    out = jax.block_until_ready(out)
    feats = [jax.block_until_ready(f) for f in feats]

    out_ref, feats_ref = sub_msd_forward_ref(x, params)

    assert out.shape == out_ref.shape, (out.shape, out_ref.shape)
    assert jnp.allclose(out, out_ref, atol=1e-5, rtol=1e-4), float(
        jnp.max(jnp.abs(out - out_ref)))
    for f, fr in zip(feats, feats_ref):
        assert f.shape == fr.shape, (f.shape, fr.shape)
        assert jnp.allclose(f, fr, atol=1e-5, rtol=1e-4), float(
            jnp.max(jnp.abs(f - fr)))

    print("KERNEL_OK")
</pallas_src>

<mosaic_0001>
module attributes {stable_mosaic.version = 11 : i64} {
  func.func @_sub_msd_kernel(%arg0: i32, %arg1: memref<1x1x64xf32, #tpu.memory_space<vmem>>, %arg2: memref<8x5xf32, #tpu.memory_space<vmem>>, %arg3: memref<8x1xf32, #tpu.memory_space<vmem>>, %arg4: memref<16x56xf32, #tpu.memory_space<vmem>>, %arg5: memref<16x1xf32, #tpu.memory_space<vmem>>, %arg6: memref<16x112xf32, #tpu.memory_space<vmem>>, %arg7: memref<16x1xf32, #tpu.memory_space<vmem>>, %arg8: memref<16x80xf32, #tpu.memory_space<vmem>>, %arg9: memref<16x1xf32, #tpu.memory_space<vmem>>, %arg10: memref<1x48xf32, #tpu.memory_space<vmem>>, %arg11: memref<1x1xf32, #tpu.memory_space<vmem>>, %arg12: memref<1x8x64xf32, #tpu.memory_space<vmem>>, %arg13: memref<1x16x32xf32, #tpu.memory_space<vmem>>, %arg14: memref<1x16x16xf32, #tpu.memory_space<vmem>>, %arg15: memref<1x16x16xf32, #tpu.memory_space<vmem>>, %arg16: memref<1x1x20xf32, #tpu.memory_space<vmem>>, %arg17: memref<5x64xf32, #tpu.memory_space<vmem>>, %arg18: memref<56x64xf32, #tpu.memory_space<vmem>>, %arg19: memref<112x32xf32, #tpu.memory_space<vmem>>, %arg20: memref<80x16xf32, #tpu.memory_space<vmem>>, %arg21: memref<48x20xf32, #tpu.memory_space<vmem>>) attributes {dimension_semantics = [#tpu.dimension_semantics<parallel>], iteration_bounds = array<i64: 2>, scalar_prefetch = 0 : i64, scratch_operands = 5 : i64, tpu.core_type = #tpu.core_type<tc>, window_params = [{transform_indices = @transform_0, window_bounds = array<i64: 1, 1, 64>}, {pipeline_mode = #tpu.pipeline_mode<synchronous>, transform_indices = @transform_1, window_bounds = array<i64: 8, 5>}, {pipeline_mode = #tpu.pipeline_mode<synchronous>, transform_indices = @transform_2, window_bounds = array<i64: 8, 1>}, {pipeline_mode = #tpu.pipeline_mode<synchronous>, transform_indices = @transform_3, window_bounds = array<i64: 16, 56>}, {pipeline_mode = #tpu.pipeline_mode<synchronous>, transform_indices = @transform_4, window_bounds = array<i64: 16, 1>}, {pipeline_mode = #tpu.pipeline_mode<synchronous>, transform_indices = @transform_5, window_bounds = array<i64: 16, 112>}, {pipeline_mode = #tpu.pipeline_mode<synchronous>, transform_indices = @transform_6, window_bounds = array<i64: 16, 1>}, {pipeline_mode = #tpu.pipeline_mode<synchronous>, transform_indices = @transform_7, window_bounds = array<i64: 16, 80>}, {pipeline_mode = #tpu.pipeline_mode<synchronous>, transform_indices = @transform_8, window_bounds = array<i64: 16, 1>}, {pipeline_mode = #tpu.pipeline_mode<synchronous>, transform_indices = @transform_9, window_bounds = array<i64: 1, 48>}, {pipeline_mode = #tpu.pipeline_mode<synchronous>, transform_indices = @transform_10, window_bounds = array<i64: 1, 1>}, {transform_indices = @transform_11, window_bounds = array<i64: 1, 8, 64>}, {transform_indices = @transform_12, window_bounds = array<i64: 1, 16, 32>}, {transform_indices = @transform_13, window_bounds = array<i64: 1, 16, 16>}, {transform_indices = @transform_14, window_bounds = array<i64: 1, 16, 16>}, {transform_indices = @transform_15, window_bounds = array<i64: 1, 1, 20>}]} {
    %c0 = arith.constant 0 : index
    %c0_0 = arith.constant 0 : index
    %c0_1 = arith.constant 0 : index
    %0 = vector.load %arg1[%c0, %c0_0, %c0_1] : memref<1x1x64xf32, #tpu.memory_space<vmem>>, vector<1x1x64xf32>
    %1 = vector.shape_cast %0 : vector<1x1x64xf32> to vector<1x64xf32>
    %cst = arith.constant 0.000000e+00 : f32
    %2 = vector.broadcast %cst : f32 to vector<5x64xf32>
    %c0_2 = arith.constant 0 : index
    %c0_3 = arith.constant 0 : index
    %3 = vector.load %arg17[%c0_2, %c0_3] : memref<5x64xf32, #tpu.memory_space<vmem>>, vector<5x64xf32>
    tpu.vector_store %arg17[%c0_2, %c0_3], %2 {strides = array<i32>} : memref<5x64xf32, #tpu.memory_space<vmem>>, vector<5x64xf32>,
    %4 = vector.extract_strided_slice %1 {offsets = [0, 0], sizes = [1, 62], strides = [1, 1]} : vector<1x64xf32> to vector<1x62xf32>
    %c0_4 = arith.constant 0 : index
    %c2 = arith.constant 2 : index
    %5 = vector.load %arg17[%c0_4, %c2] : memref<5x64xf32, #tpu.memory_space<vmem>>, vector<1x62xf32>
    tpu.vector_store %arg17[%c0_4, %c2], %4 {strides = array<i32>} : memref<5x64xf32, #tpu.memory_space<vmem>>, vector<1x62xf32>,
    %6 = vector.extract_strided_slice %1 {offsets = [0, 0], sizes = [1, 63], strides = [1, 1]} : vector<1x64xf32> to vector<1x63xf32>
    %c1 = arith.constant 1 : index
    %c1_5 = arith.constant 1 : index
    %7 = vector.load %arg17[%c1, %c1_5] : memref<5x64xf32, #tpu.memory_space<vmem>>, vector<1x63xf32>
    tpu.vector_store %arg17[%c1, %c1_5], %6 {strides = array<i32>} : memref<5x64xf32, #tpu.memory_space<vmem>>, vector<1x63xf32>,
    %c2_6 = arith.constant 2 : index
    %c0_7 = arith.constant 0 : index
    %8 = vector.load %arg17[%c2_6, %c0_7] : memref<5x64xf32, #tpu.memory_space<vmem>>, vector<1x64xf32>
    tpu.vector_store %arg17[%c2_6, %c0_7], %1 {strides = array<i32>} : memref<5x64xf32, #tpu.memory_space<vmem>>, vector<1x64xf32>,
    %9 = vector.extract_strided_slice %1 {offsets = [0, 1], sizes = [1, 63], strides = [1, 1]} : vector<1x64xf32> to vector<1x63xf32>
    %c3 = arith.constant 3 : index
    %c0_8 = arith.constant 0 : index
    %10 = vector.load %arg17[%c3, %c0_8] : memref<5x64xf32, #tpu.memory_space<vmem>>, vector<1x63xf32>
    tpu.vector_store %arg17[%c3, %c0_8], %9 {strides = array<i32>} : memref<5x64xf32, #tpu.memory_space<vmem>>, vector<1x63xf32>,
    %11 = vector.extract_strided_slice %1 {offsets = [0, 2], sizes = [1, 62], strides = [1, 1]} : vector<1x64xf32> to vector<1x62xf32>
    %c4 = arith.constant 4 : index
    %c0_9 = arith.constant 0 : index
    %12 = vector.load %arg17[%c4, %c0_9] : memref<5x64xf32, #tpu.memory_space<vmem>>, vector<1x62xf32>
    tpu.vector_store %arg17[%c4, %c0_9], %11 {strides = array<i32>} : memref<5x64xf32, #tpu.memory_space<vmem>>, vector<1x62xf32>,
    %c0_10 = arith.constant 0 : index
    %c0_11 = arith.constant 0 : index
    %13 = vector.load %arg2[%c0_10, %c0_11] : memref<8x5xf32, #tpu.memory_space<vmem>>, vector<8x5xf32>
    %c0_12 = arith.constant 0 : index
    %c0_13 = arith.constant 0 : index
    %14 = vector.load %arg17[%c0_12, %c0_13] : memref<5x64xf32, #tpu.memory_space<vmem>>, vector<5x64xf32>
    %cst_14 = arith.constant dense<0.000000e+00> : vector<8x64xf32>
    %15 = tpu.matmul %13, %14, %cst_14 {dimension_numbers = #tpu.dot_dimension_numbers<[1], [0], [0], [1], [0, 0, 1, 1], [], []>, precision = #tpu.contract_precision<fp32>} : vector<8x5xf32>, vector<5x64xf32>, vector<8x64xf32> -> vector<8x64xf32>
    %c0_15 = arith.constant 0 : index
    %c0_16 = arith.constant 0 : index
    %16 = vector.load %arg3[%c0_15, %c0_16] : memref<8x1xf32, #tpu.memory_space<vmem>>, vector<8x1xf32>
    %17 = vector.broadcast %16 : vector<8x1xf32> to vector<8x64xf32>
    %18 = arith.addf %15, %17 : vector<8x64xf32>
    %cst_17 = arith.constant 0.000000e+00 : f32
    %19 = vector.broadcast %cst_17 : f32 to vector<8x64xf32>
    %20 = arith.cmpf oge, %18, %19 : vector<8x64xf32>
    %cst_18 = arith.constant 1.000000e-01 : f32
    %21 = vector.broadcast %cst_18 : f32 to vector<8x64xf32>
    %22 = arith.mulf %21, %18 : vector<8x64xf32>
    %23 = arith.select %20, %18, %22 : vector<8x64xi1>, vector<8x64xf32>
    %c0_19 = arith.constant 0 : index
    %c0_20 = arith.constant 0 : index
    %c0_21 = arith.constant 0 : index
    %24 = vector.load %arg12[%c0_19, %c0_20, %c0_21] : memref<1x8x64xf32, #tpu.memory_space<vmem>>, vector<1x8x64xf32>
    %25 = vector.shape_cast %24 : vector<1x8x64xf32> to vector<8x64xf32>
    %26 = vector.shape_cast %23 : vector<8x64xf32> to vector<1x8x64xf32>
    tpu.vector_store %arg12[%c0_19, %c0_20, %c0_21], %26 {strides = array<i32>} : memref<1x8x64xf32, #tpu.memory_space<vmem>>, vector<1x8x64xf32>,
    %cst_22 = arith.constant 0.000000e+00 : f32
    %27 = vector.broadcast %cst_22 : f32 to vector<56x64xf32>
    %c0_23 = arith.constant 0 : index
    %c0_24 = arith.constant 0 : index
    %28 = vector.load %arg18[%c0_23, %c0_24] : memref<56x64xf32, #tpu.memory_space<vmem>>, vector<56x64xf32>
    tpu.vector_store %arg18[%c0_23, %c0_24], %27 {strides = array<i32>} : memref<56x64xf32, #tpu.memory_space<vmem>>, vector<56x64xf32>,
    %29 = vector.extract_strided_slice %23 {offsets = [0, 0], sizes = [8, 61], strides = [1, 1]} : vector<8x64xf32> to vector<8x61xf32>
    %c0_25 = arith.constant 0 : index
    %c3_26 = arith.constant 3 : index
    %30 = vector.load %arg18[%c0_25, %c3_26] : memref<56x64xf32, #tpu.memory_space<vmem>>, vector<8x61xf32>
    tpu.vector_store %arg18[%c0_25, %c3_26], %29 {strides = array<i32>} : memref<56x64xf32, #tpu.memory_space<vmem>>, vector<8x61xf32>,
    %31 = vector.extract_strided_slice %23 {offsets = [0, 0], sizes = [8, 62], strides = [1, 1]} : vector<8x64xf32> to vector<8x62xf32>
    %c8 = arith.constant 8 : index
    %c2_27 = arith.constant 2 : index
    %32 = vector.load %arg18[%c8, %c2_27] : memref<56x64xf32, #tpu.memory_space<vmem>>, vector<8x62xf32>
    tpu.vector_store %arg18[%c8, %c2_27], %31 {strides = array<i32>} : memref<56x64xf32, #tpu.memory_space<vmem>>, vector<8x62xf32>,
    %33 = vector.extract_strided_slice %23 {offsets = [0, 0], sizes = [8, 63], strides = [1, 1]} : vector<8x64xf32> to vector<8x63xf32>
    %c16 = arith.constant 16 : index
    %c1_28 = arith.constant 1 : index
    %34 = vector.load %arg18[%c16, %c1_28] : memref<56x64xf32, #tpu.memory_space<vmem>>, vector<8x63xf32>
    tpu.vector_store %arg18[%c16, %c1_28], %33 {strides = array<i32>} : memref<56x64xf32, #tpu.memory_space<vmem>>, vector<8x63xf32>,
    %c24 = arith.constant 24 : index
    %c0_29 = arith.constant 0 : index
    %35 = vector.load %arg18[%c24, %c0_29] : memref<56x64xf32, #tpu.memory_space<vmem>>, vector<8x64xf32>
    tpu.vector_store %arg18[%c24, %c0_29], %23 {strides = array<i32>} : memref<56x64xf32, #tpu.memory_space<vmem>>, vector<8x64xf32>,
    %36 = vector.extract_strided_slice %23 {offsets = [0, 1], sizes = [8, 63], strides = [1, 1]} : vector<8x64xf32> to vector<8x63xf32>
    %c32 = arith.constant 32 : index
    %c0_30 = arith.constant 0 : index
    %37 = vector.load %arg18[%c32, %c0_30] : memref<56x64xf32, #tpu.memory_space<vmem>>, vector<8x63xf32>
    tpu.vector_store %arg18[%c32, %c0_30], %36 {strides = array<i32>} : memref<56x64xf32, #tpu.memory_space<vmem>>, vector<8x63xf32>,
    %38 = vector.extract_strided_slice %23 {offsets = [0, 2], sizes = [8, 62], strides = [1, 1]} : vector<8x64xf32> to vector<8x62xf32>
    %c40 = arith.constant 40 : index
    %c0_31 = arith.constant 0 : index
    %39 = vector.load %arg18[%c40, %c0_31] : memref<56x64xf32, #tpu.memory_space<vmem>>, vector<8x62xf32>
    tpu.vector_store %arg18[%c40, %c0_31], %38 {strides = array<i32>} : memref<56x64xf32, #tpu.memory_space<vmem>>, vector<8x62xf32>,
    %40 = vector.extract_strided_slice %23 {offsets = [0, 3], sizes = [8, 61], strides = [1, 1]} : vector<8x64xf32> to vector<8x61xf32>
    %c48 = arith.constant 48 : index
    %c0_32 = arith.constant 0 : index
    %41 = vector.load %arg18[%c48, %c0_32] : memref<56x64xf32, #tpu.memory_space<vmem>>, vector<8x61xf32>
    tpu.vector_store %arg18[%c48, %c0_32], %40 {strides = array<i32>} : memref<56x64xf32, #tpu.memory_space<vmem>>, vector<8x61xf32>,
    %c0_33 = arith.constant 0 : index
    %c0_34 = arith.constant 0 : index
    %42 = vector.load %arg4[%c0_33, %c0_34] : memref<16x56xf32, #tpu.memory_space<vmem>>, vector<16x56xf32>
    %c0_35 = arith.constant 0 : index
    %c0_36 = arith.constant 0 : index
    %43 = vector.load %arg18[%c0_35, %c0_36] : memref<56x64xf32, #tpu.memory_space<vmem>>, vector<56x64xf32>
    %cst_37 = arith.constant dense<0.000000e+00> : vector<16x64xf32>
    %44 = tpu.matmul %42, %43, %cst_37 {dimension_numbers = #tpu.dot_dimension_numbers<[1], [0], [0], [1], [0, 0, 1, 1], [], []>, precision = #tpu.contract_precision<fp32>} : vector<16x56xf32>, vector<56x64xf32>, vector<16x64xf32> -> vector<16x64xf32>
    %45 = tpu.iota {dimensions = array<i32: 0>} : vector<64x32xi32>
    %46 = tpu.iota {dimensions = array<i32: 1>} : vector<64x32xi32>
    %c2_i32 = arith.constant 2 : i32
    %47 = vector.broadcast %c2_i32 : i32 to vector<64x32xi32>
    %48 = arith.muli %47, %46 : vector<64x32xi32>
    %49 = arith.cmpi eq, %45, %48 : vector<64x32xi32>
    %50 = arith.extui %49 : vector<64x32xi1> to vector<64x32xi32>
    %51 = arith.sitofp %50 : vector<64x32xi32> to vector<64x32xf32>
    %cst_38 = arith.constant dense<0.000000e+00> : vector<16x32xf32>
    %52 = tpu.matmul %44, %51, %cst_38 {dimension_numbers = #tpu.dot_dimension_numbers<[1], [0], [0], [1], [0, 0, 1, 1], [], []>, precision = #tpu.contract_precision<fp32>} : vector<16x64xf32>, vector<64x32xf32>, vector<16x32xf32> -> vector<16x32xf32>
    %c0_39 = arith.constant 0 : index
    %c0_40 = arith.constant 0 : index
    %53 = vector.load %arg5[%c0_39, %c0_40] : memref<16x1xf32, #tpu.memory_space<vmem>>, vector<16x1xf32>
    %54 = vector.broadcast %53 : vector<16x1xf32> to vector<16x32xf32>
    %55 = arith.addf %52, %54 : vector<16x32xf32>
    %cst_41 = arith.constant 0.000000e+00 : f32
    %56 = vector.broadcast %cst_41 : f32 to vector<16x32xf32>
    %57 = arith.cmpf oge, %55, %56 : vector<16x32xf32>
    %cst_42 = arith.constant 1.000000e-01 : f32
    %58 = vector.broadcast %cst_42 : f32 to vector<16x32xf32>
    %59 = arith.mulf %58, %55 : vector<16x32xf32>
    %60 = arith.select %57, %55, %59 : vector<16x32xi1>, vector<16x32xf32>
    %c0_43 = arith.constant 0 : index
    %c0_44 = arith.constant 0 : index
    %c0_45 = arith.constant 0 : index
    %61 = vector.load %arg13[%c0_43, %c0_44, %c0_45] : memref<1x16x32xf32, #tpu.memory_space<vmem>>, vector<1x16x32xf32>
    %62 = vector.shape_cast %61 : vector<1x16x32xf32> to vector<16x32xf32>
    %63 = vector.shape_cast %60 : vector<16x32xf32> to vector<1x16x32xf32>
    tpu.vector_store %arg13[%c0_43, %c0_44, %c0_45], %63 {strides = array<i32>} : memref<1x16x32xf32, #tpu.memory_space<vmem>>, vector<1x16x32xf32>,
    %cst_46 = arith.constant 0.000000e+00 : f32
    %64 = vector.broadcast %cst_46 : f32 to vector<112x32xf32>
    %c0_47 = arith.constant 0 : index
    %c0_48 = arith.constant 0 : index
    %65 = vector.load %arg19[%c0_47, %c0_48] : memref<112x32xf32, #tpu.memory_space<vmem>>, vector<112x32xf32>
    tpu.vector_store %arg19[%c0_47, %c0_48], %64 {strides = array<i32>} : memref<112x32xf32, #tpu.memory_space<vmem>>, vector<112x32xf32>,
    %66 = vector.extract_strided_slice %60 {offsets = [0, 0], sizes = [16, 29], strides = [1, 1]} : vector<16x32xf32> to vector<16x29xf32>
    %c0_49 = arith.constant 0 : index
    %c3_50 = arith.constant 3 : index
    %67 = vector.load %arg19[%c0_49, %c3_50] : memref<112x32xf32, #tpu.memory_space<vmem>>, vector<16x29xf32>
    tpu.vector_store %arg19[%c0_49, %c3_50], %66 {strides = array<i32>} : memref<112x32xf32, #tpu.memory_space<vmem>>, vector<16x29xf32>,
    %68 = vector.extract_strided_slice %60 {offsets = [0, 0], sizes = [16, 30], strides = [1, 1]} : vector<16x32xf32> to vector<16x30xf32>
    %c16_51 = arith.constant 16 : index
    %c2_52 = arith.constant 2 : index
    %69 = vector.load %arg19[%c16_51, %c2_52] : memref<112x32xf32, #tpu.memory_space<vmem>>, vector<16x30xf32>
    tpu.vector_store %arg19[%c16_51, %c2_52], %68 {strides = array<i32>} : memref<112x32xf32, #tpu.memory_space<vmem>>, vector<16x30xf32>,
    %70 = vector.extract_strided_slice %60 {offsets = [0, 0], sizes = [16, 31], strides = [1, 1]} : vector<16x32xf32> to vector<16x31xf32>
    %c32_53 = arith.constant 32 : index
    %c1_54 = arith.constant 1 : index
    %71 = vector.load %arg19[%c32_53, %c1_54] : memref<112x32xf32, #tpu.memory_space<vmem>>, vector<16x31xf32>
    tpu.vector_store %arg19[%c32_53, %c1_54], %70 {strides = array<i32>} : memref<112x32xf32, #tpu.memory_space<vmem>>, vector<16x31xf32>,
    %c48_55 = arith.constant 48 : index
    %c0_56 = arith.constant 0 : index
    %72 = vector.load %arg19[%c48_55, %c0_56] : memref<112x32xf32, #tpu.memory_space<vmem>>, vector<16x32xf32>
    tpu.vector_store %arg19[%c48_55, %c0_56], %60 {strides = array<i32>} : memref<112x32xf32, #tpu.memory_space<vmem>>, vector<16x32xf32>,
    %73 = vector.extract_strided_slice %60 {offsets = [0, 1], sizes = [16, 31], strides = [1, 1]} : vector<16x32xf32> to vector<16x31xf32>
    %c64 = arith.constant 64 : index
    %c0_57 = arith.constant 0 : index
    %74 = vector.load %arg19[%c64, %c0_57] : memref<112x32xf32, #tpu.memory_space<vmem>>, vector<16x31xf32>
    tpu.vector_store %arg19[%c64, %c0_57], %73 {strides = array<i32>} : memref<112x32xf32, #tpu.memory_space<vmem>>, vector<16x31xf32>,
    %75 = vector.extract_strided_slice %60 {offsets = [0, 2], sizes = [16, 30], strides = [1, 1]} : vector<16x32xf32> to vector<16x30xf32>
    %c80 = arith.constant 80 : index
    %c0_58 = arith.constant 0 : index
    %76 = vector.load %arg19[%c80, %c0_58] : memref<112x32xf32, #tpu.memory_space<vmem>>, vector<16x30xf32>
    tpu.vector_store %arg19[%c80, %c0_58], %75 {strides = array<i32>} : memref<112x32xf32, #tpu.memory_space<vmem>>, vector<16x30xf32>,
    %77 = vector.extract_strided_slice %60 {offsets = [0, 3], sizes = [16, 29], strides = [1, 1]} : vector<16x32xf32> to vector<16x29xf32>
    %c96 = arith.constant 96 : index
    %c0_59 = arith.constant 0 : index
    %78 = vector.load %arg19[%c96, %c0_59] : memref<112x32xf32, #tpu.memory_space<vmem>>, vector<16x29xf32>
    tpu.vector_store %arg19[%c96, %c0_59], %77 {strides = array<i32>} : memref<112x32xf32, #tpu.memory_space<vmem>>, vector<16x29xf32>,
    %c0_60 = arith.constant 0 : index
    %c0_61 = arith.constant 0 : index
    %79 = vector.load %arg6[%c0_60, %c0_61] : memref<16x112xf32, #tpu.memory_space<vmem>>, vector<16x112xf32>
    %c0_62 = arith.constant 0 : index
    %c0_63 = arith.constant 0 : index
    %80 = vector.load %arg19[%c0_62, %c0_63] : memref<112x32xf32, #tpu.memory_space<vmem>>, vector<112x32xf32>
    %cst_64 = arith.constant dense<0.000000e+00> : vector<16x32xf32>
    %81 = tpu.matmul %79, %80, %cst_64 {dimension_numbers = #tpu.dot_dimension_numbers<[1], [0], [0], [1], [0, 0, 1, 1], [], []>, precision = #tpu.contract_precision<fp32>} : vector<16x112xf32>, vector<112x32xf32>, vector<16x32xf32> -> vector<16x32xf32>
    %82 = tpu.iota {dimensions = array<i32: 0>} : vector<32x16xi32>
    %83 = tpu.iota {dimensions = array<i32: 1>} : vector<32x16xi32>
    %c2_i32_65 = arith.constant 2 : i32
    %84 = vector.broadcast %c2_i32_65 : i32 to vector<32x16xi32>
    %85 = arith.muli %84, %83 : vector<32x16xi32>
    %86 = arith.cmpi eq, %82, %85 : vector<32x16xi32>
    %87 = arith.extui %86 : vector<32x16xi1> to vector<32x16xi32>
    %88 = arith.sitofp %87 : vector<32x16xi32> to vector<32x16xf32>
    %cst_66 = arith.constant dense<0.000000e+00> : vector<16x16xf32>
    %89 = tpu.matmul %81, %88, %cst_66 {dimension_numbers = #tpu.dot_dimension_numbers<[1], [0], [0], [1], [0, 0, 1, 1], [], []>, precision = #tpu.contract_precision<fp32>} : vector<16x32xf32>, vector<32x16xf32>, vector<16x16xf32> -> vector<16x16xf32>
    %c0_67 = arith.constant 0 : index
    %c0_68 = arith.constant 0 : index
    %90 = vector.load %arg7[%c0_67, %c0_68] : memref<16x1xf32, #tpu.memory_space<vmem>>, vector<16x1xf32>
    %91 = vector.broadcast %90 : vector<16x1xf32> to vector<16x16xf32>
    %92 = arith.addf %89, %91 : vector<16x16xf32>
    %cst_69 = arith.constant 0.000000e+00 : f32
    %93 = vector.broadcast %cst_69 : f32 to vector<16x16xf32>
    %94 = arith.cmpf oge, %92, %93 : vector<16x16xf32>
    %cst_70 = arith.constant 1.000000e-01 : f32
    %95 = vector.broadcast %cst_70 : f32 to vector<16x16xf32>
    %96 = arith.mulf %95, %92 : vector<16x16xf32>
    %97 = arith.select %94, %92, %96 : vector<16x16xi1>, vector<16x16xf32>
    %c0_71 = arith.constant 0 : index
    %c0_72 = arith.constant 0 : index
    %c0_73 = arith.constant 0 : index
    %98 = vector.load %arg14[%c0_71, %c0_72, %c0_73] : memref<1x16x16xf32, #tpu.memory_space<vmem>>, vector<1x16x16xf32>
    %99 = vector.shape_cast %98 : vector<1x16x16xf32> to vector<16x16xf32>
    %100 = vector.shape_cast %97 : vector<16x16xf32> to vector<1x16x16xf32>
    tpu.vector_store %arg14[%c0_71, %c0_72, %c0_73], %100 {strides = array<i32>} : memref<1x16x16xf32, #tpu.memory_space<vmem>>, vector<1x16x16xf32>,
    %cst_74 = arith.constant 0.000000e+00 : f32
    %101 = vector.broadcast %cst_74 : f32 to vector<80x16xf32>
    %c0_75 = arith.constant 0 : index
    %c0_76 = arith.constant 0 : index
    %102 = vector.load %arg20[%c0_75, %c0_76] : memref<80x16xf32, #tpu.memory_space<vmem>>, vector<80x16xf32>
    tpu.vector_store %arg20[%c0_75, %c0_76], %101 {strides = array<i32>} : memref<80x16xf32, #tpu.memory_space<vmem>>, vector<80x16xf32>,
    %103 = vector.extract_strided_slice %97 {offsets = [0, 0], sizes = [16, 14], strides = [1, 1]} : vector<16x16xf32> to vector<16x14xf32>
    %c0_77 = arith.constant 0 : index
    %c2_78 = arith.constant 2 : index
    %104 = vector.load %arg20[%c0_77, %c2_78] : memref<80x16xf32, #tpu.memory_space<vmem>>, vector<16x14xf32>
    tpu.vector_store %arg20[%c0_77, %c2_78], %103 {strides = array<i32>} : memref<80x16xf32, #tpu.memory_space<vmem>>, vector<16x14xf32>,
    %105 = vector.extract_strided_slice %97 {offsets = [0, 0], sizes = [16, 15], strides = [1, 1]} : vector<16x16xf32> to vector<16x15xf32>
    %c16_79 = arith.constant 16 : index
    %c1_80 = arith.constant 1 : index
    %106 = vector.load %arg20[%c16_79, %c1_80] : memref<80x16xf32, #tpu.memory_space<vmem>>, vector<16x15xf32>
    tpu.vector_store %arg20[%c16_79, %c1_80], %105 {strides = array<i32>} : memref<80x16xf32, #tpu.memory_space<vmem>>, vector<16x15xf32>,
    %c32_81 = arith.constant 32 : index
    %c0_82 = arith.constant 0 : index
    %107 = vector.load %arg20[%c32_81, %c0_82] : memref<80x16xf32, #tpu.memory_space<vmem>>, vector<16x16xf32>
    tpu.vector_store %arg20[%c32_81, %c0_82], %97 {strides = array<i32>} : memref<80x16xf32, #tpu.memory_space<vmem>>, vector<16x16xf32>,
    %108 = vector.extract_strided_slice %97 {offsets = [0, 1], sizes = [16, 15], strides = [1, 1]} : vector<16x16xf32> to vector<16x15xf32>
    %c48_83 = arith.constant 48 : index
    %c0_84 = arith.constant 0 : index
    %109 = vector.load %arg20[%c48_83, %c0_84] : memref<80x16xf32, #tpu.memory_space<vmem>>, vector<16x15xf32>
    tpu.vector_store %arg20[%c48_83, %c0_84], %108 {strides = array<i32>} : memref<80x16xf32, #tpu.memory_space<vmem>>, vector<16x15xf32>,
    %110 = vector.extract_strided_slice %97 {offsets = [0, 2], sizes = [16, 14], strides = [1, 1]} : vector<16x16xf32> to vector<16x14xf32>
    %c64_85 = arith.constant 64 : index
    %c0_86 = arith.constant 0 : index
    %111 = vector.load %arg20[%c64_85, %c0_86] : memref<80x16xf32, #tpu.memory_space<vmem>>, vector<16x14xf32>
    tpu.vector_store %arg20[%c64_85, %c0_86], %110 {strides = array<i32>} : memref<80x16xf32, #tpu.memory_space<vmem>>, vector<16x14xf32>,
    %c0_87 = arith.constant 0 : index
    %c0_88 = arith.constant 0 : index
    %112 = vector.load %arg8[%c0_87, %c0_88] : memref<16x80xf32, #tpu.memory_space<vmem>>, vector<16x80xf32>
    %c0_89 = arith.constant 0 : index
    %c0_90 = arith.constant 0 : index
    %113 = vector.load %arg20[%c0_89, %c0_90] : memref<80x16xf32, #tpu.memory_space<vmem>>, vector<80x16xf32>
    %cst_91 = arith.constant dense<0.000000e+00> : vector<16x16xf32>
    %114 = tpu.matmul %112, %113, %cst_91 {dimension_numbers = #tpu.dot_dimension_numbers<[1], [0], [0], [1], [0, 0, 1, 1], [], []>, precision = #tpu.contract_precision<fp32>} : vector<16x80xf32>, vector<80x16xf32>, vector<16x16xf32> -> vector<16x16xf32>
    %c0_92 = arith.constant 0 : index
    %c0_93 = arith.constant 0 : index
    %115 = vector.load %arg9[%c0_92, %c0_93] : memref<16x1xf32, #tpu.memory_space<vmem>>, vector<16x1xf32>
    %116 = vector.broadcast %115 : vector<16x1xf32> to vector<16x16xf32>
    %117 = arith.addf %114, %116 : vector<16x16xf32>
    %cst_94 = arith.constant 0.000000e+00 : f32
    %118 = vector.broadcast %cst_94 : f32 to vector<16x16xf32>
    %119 = arith.cmpf oge, %117, %118 : vector<16x16xf32>
    %cst_95 = arith.constant 1.000000e-01 : f32
    %120 = vector.broadcast %cst_95 : f32 to vector<16x16xf32>
    %121 = arith.mulf %120, %117 : vector<16x16xf32>
    %122 = arith.select %119, %117, %121 : vector<16x16xi1>, vector<16x16xf32>
    %c0_96 = arith.constant 0 : index
    %c0_97 = arith.constant 0 : index
    %c0_98 = arith.constant 0 : index
    %123 = vector.load %arg15[%c0_96, %c0_97, %c0_98] : memref<1x16x16xf32, #tpu.memory_space<vmem>>, vector<1x16x16xf32>
    %124 = vector.shape_cast %123 : vector<1x16x16xf32> to vector<16x16xf32>
    %125 = vector.shape_cast %122 : vector<16x16xf32> to vector<1x16x16xf32>
    tpu.vector_store %arg15[%c0_96, %c0_97, %c0_98], %125 {strides = array<i32>} : memref<1x16x16xf32, #tpu.memory_space<vmem>>, vector<1x16x16xf32>,
    %cst_99 = arith.constant 0.000000e+00 : f32
    %126 = vector.broadcast %cst_99 : f32 to vector<48x20xf32>
    %c0_100 = arith.constant 0 : index
    %c0_101 = arith.constant 0 : index
    %127 = vector.load %arg21[%c0_100, %c0_101] : memref<48x20xf32, #tpu.memory_space<vmem>>, vector<48x20xf32>
    tpu.vector_store %arg21[%c0_100, %c0_101], %126 {strides = array<i32>} : memref<48x20xf32, #tpu.memory_space<vmem>>, vector<48x20xf32>,
    %c0_102 = arith.constant 0 : index
    %c3_103 = arith.constant 3 : index
    %128 = vector.load %arg21[%c0_102, %c3_103] : memref<48x20xf32, #tpu.memory_space<vmem>>, vector<16x16xf32>
    tpu.vector_store %arg21[%c0_102, %c3_103], %122 {strides = array<i32>} : memref<48x20xf32, #tpu.memory_space<vmem>>, vector<16x16xf32>,
    %c16_104 = arith.constant 16 : index
    %c2_105 = arith.constant 2 : index
    %129 = vector.load %arg21[%c16_104, %c2_105] : memref<48x20xf32, #tpu.memory_space<vmem>>, vector<16x16xf32>
    tpu.vector_store %arg21[%c16_104, %c2_105], %122 {strides = array<i32>} : memref<48x20xf32, #tpu.memory_space<vmem>>, vector<16x16xf32>,
    %c32_106 = arith.constant 32 : index
    %c1_107 = arith.constant 1 : index
    %130 = vector.load %arg21[%c32_106, %c1_107] : memref<48x20xf32, #tpu.memory_space<vmem>>, vector<16x16xf32>
    tpu.vector_store %arg21[%c32_106, %c1_107], %122 {strides = array<i32>} : memref<48x20xf32, #tpu.memory_space<vmem>>, vector<16x16xf32>,
    %c0_108 = arith.constant 0 : index
    %c0_109 = arith.constant 0 : index
    %131 = vector.load %arg10[%c0_108, %c0_109] : memref<1x48xf32, #tpu.memory_space<vmem>>, vector<1x48xf32>
    %c0_110 = arith.constant 0 : index
    %c0_111 = arith.constant 0 : index
    %132 = vector.load %arg21[%c0_110, %c0_111] : memref<48x20xf32, #tpu.memory_space<vmem>>, vector<48x20xf32>
    %cst_112 = arith.constant dense<0.000000e+00> : vector<1x20xf32>
    %133 = tpu.matmul %131, %132, %cst_112 {dimension_numbers = #tpu.dot_dimension_numbers<[1], [0], [0], [1], [0, 0, 1, 1], [], []>, precision = #tpu.contract_precision<fp32>} : vector<1x48xf32>, vector<48x20xf32>, vector<1x20xf32> -> vector<1x20xf32>
    %c0_113 = arith.constant 0 : index
    %c0_114 = arith.constant 0 : index
    %134 = vector.load %arg11[%c0_113, %c0_114] : memref<1x1xf32, #tpu.memory_space<vmem>>, vector<1x1xf32>
    %135 = vector.broadcast %134 : vector<1x1xf32> to vector<1x20xf32>
    %136 = arith.addf %133, %135 : vector<1x20xf32>
    %c0_115 = arith.constant 0 : index
    %c0_116 = arith.constant 0 : index
    %c0_117 = arith.constant 0 : index
    %137 = vector.load %arg16[%c0_115, %c0_116, %c0_117] : memref<1x1x20xf32, #tpu.memory_space<vmem>>, vector<1x1x20xf32>
    %138 = vector.shape_cast %137 : vector<1x1x20xf32> to vector<1x20xf32>
    %139 = vector.shape_cast %136 : vector<1x20xf32> to vector<1x1x20xf32>
    tpu.vector_store %arg16[%c0_115, %c0_116, %c0_117], %139 {strides = array<i32>} : memref<1x1x20xf32, #tpu.memory_space<vmem>>, vector<1x1x20xf32>,
    return
  }
  func.func @transform_0(%arg0: i32) -> (i32, i32, i32) {
    %c0_i32 = arith.constant 0 : i32
    %c0_i32_0 = arith.constant 0 : i32
    %c0_i32_1 = arith.constant 0 : i32
    return %arg0, %c0_i32, %c0_i32_0 : i32, i32, i32
  }
  func.func @transform_1(%arg0: i32) -> (i32, i32) {
    %c0_i32 = arith.constant 0 : i32
    %c0_i32_0 = arith.constant 0 : i32
    %c0_i32_1 = arith.constant 0 : i32
    return %c0_i32, %c0_i32_0 : i32, i32
  }
  func.func @transform_2(%arg0: i32) -> (i32, i32) {
    %c0_i32 = arith.constant 0 : i32
    %c0_i32_0 = arith.constant 0 : i32
    %c0_i32_1 = arith.constant 0 : i32
    return %c0_i32, %c0_i32_0 : i32, i32
  }
  func.func @transform_3(%arg0: i32) -> (i32, i32) {
    %c0_i32 = arith.constant 0 : i32
    %c0_i32_0 = arith.constant 0 : i32
    %c0_i32_1 = arith.constant 0 : i32
    return %c0_i32, %c0_i32_0 : i32, i32
  }
  func.func @transform_4(%arg0: i32) -> (i32, i32) {
    %c0_i32 = arith.constant 0 : i32
    %c0_i32_0 = arith.constant 0 : i32
    %c0_i32_1 = arith.constant 0 : i32
    return %c0_i32, %c0_i32_0 : i32, i32
  }
  func.func @transform_5(%arg0: i32) -> (i32, i32) {
    %c0_i32 = arith.constant 0 : i32
    %c0_i32_0 = arith.constant 0 : i32
    %c0_i32_1 = arith.constant 0 : i32
    return %c0_i32, %c0_i32_0 : i32, i32
  }
  func.func @transform_6(%arg0: i32) -> (i32, i32) {
    %c0_i32 = arith.constant 0 : i32
    %c0_i32_0 = arith.constant 0 : i32
    %c0_i32_1 = arith.constant 0 : i32
    return %c0_i32, %c0_i32_0 : i32, i32
  }
  func.func @transform_7(%arg0: i32) -> (i32, i32) {
    %c0_i32 = arith.constant 0 : i32
    %c0_i32_0 = arith.constant 0 : i32
    %c0_i32_1 = arith.constant 0 : i32
    return %c0_i32, %c0_i32_0 : i32, i32
  }
  func.func @transform_8(%arg0: i32) -> (i32, i32) {
    %c0_i32 = arith.constant 0 : i32
    %c0_i32_0 = arith.constant 0 : i32
    %c0_i32_1 = arith.constant 0 : i32
    return %c0_i32, %c0_i32_0 : i32, i32
  }
  func.func @transform_9(%arg0: i32) -> (i32, i32) {
    %c0_i32 = arith.constant 0 : i32
    %c0_i32_0 = arith.constant 0 : i32
    %c0_i32_1 = arith.constant 0 : i32
    return %c0_i32, %c0_i32_0 : i32, i32
  }
  func.func @transform_10(%arg0: i32) -> (i32, i32) {
    %c0_i32 = arith.constant 0 : i32
    %c0_i32_0 = arith.constant 0 : i32
    %c0_i32_1 = arith.constant 0 : i32
    return %c0_i32, %c0_i32_0 : i32, i32
  }
  func.func @transform_11(%arg0: i32) -> (i32, i32, i32) {
    %c0_i32 = arith.constant 0 : i32
    %c0_i32_0 = arith.constant 0 : i32
    %c0_i32_1 = arith.constant 0 : i32
    return %arg0, %c0_i32, %c0_i32_0 : i32, i32, i32
  }
  func.func @transform_12(%arg0: i32) -> (i32, i32, i32) {
    %c0_i32 = arith.constant 0 : i32
    %c0_i32_0 = arith.constant 0 : i32
    %c0_i32_1 = arith.constant 0 : i32
    return %arg0, %c0_i32, %c0_i32_0 : i32, i32, i32
  }
  func.func @transform_13(%arg0: i32) -> (i32, i32, i32) {
    %c0_i32 = arith.constant 0 : i32
    %c0_i32_0 = arith.constant 0 : i32
    %c0_i32_1 = arith.constant 0 : i32
    return %arg0, %c0_i32, %c0_i32_0 : i32, i32, i32
  }
  func.func @transform_14(%arg0: i32) -> (i32, i32, i32) {
    %c0_i32 = arith.constant 0 : i32
    %c0_i32_0 = arith.constant 0 : i32
    %c0_i32_1 = arith.constant 0 : i32
    return %arg0, %c0_i32, %c0_i32_0 : i32, i32, i32
  }
  func.func @transform_15(%arg0: i32) -> (i32, i32, i32) {
    %c0_i32 = arith.constant 0 : i32
    %c0_i32_0 = arith.constant 0 : i32
    %c0_i32_1 = arith.constant 0 : i32
    return %arg0, %c0_i32, %c0_i32_0 : i32, i32, i32
  }
}

</mosaic_0001>

<bundles_post_ra>
// kernel: sub_msd_forward.1
= control target key start
LH: loop header
LB: loop body
LE: loop exit
PB: predicated region body
PF: predicated region fallthrough
CT: control target
= control target key end

     0   :  { %s4466_s0 = inlined_call_operand.vmem [shape: f32[2,1,64], index: 0, kind: input, shape index: {}]   ;;  %s4467_s1 = inlined_call_operand.vmem [shape: f32[8,5], index: 1, kind: input, shape index: {}]   ;;  %s4468_s2 = inlined_call_operand.vmem [shape: f32[8,1], index: 2, kind: input, shape index: {}]   ;;  %s4469_s3 = inlined_call_operand.vmem [shape: f32[16,56], index: 3, kind: input, shape index: {}]   ;;  %s4470_s4 = inlined_call_operand.vmem [shape: f32[16,1], index: 4, kind: input, shape index: {}]   ;;  %s4471_s5 = inlined_call_operand.vmem [shape: f32[16,112], index: 5, kind: input, shape index: {}]   ;;  %s4472_s6 = inlined_call_operand.vmem [shape: f32[16,1], index: 6, kind: input, shape index: {}]   ;;  %s4473_s7 = inlined_call_operand.vmem [shape: f32[16,80], index: 7, kind: input, shape index: {}]   ;;  %s4474_s8 = inlined_call_operand.vmem [shape: f32[16,1], index: 8, kind: input, shape index: {}]   ;;  %s4475_s9 = inlined_call_operand.vmem [shape: f32[1,48], index: 9, kind: input, shape index: {}]   ;;  %s4476_s10 = inlined_call_operand.<no memory space> [shape: f32[1,1], index: 10, kind: input, shape index: {}]   ;;  %s4477_s11 = inlined_call_operand.hbm [shape: f32[2,8,64], index: 11, kind: output, shape index: {0}]   ;;  %s4478_s12 = inlined_call_operand.hbm [shape: f32[2,16,32], index: 12, kind: output, shape index: {1}]   ;;  %s4479_s13 = inlined_call_operand.hbm [shape: f32[2,16,16], index: 13, kind: output, shape index: {2}]   ;;  %s4480_s14 = inlined_call_operand.hbm [shape: f32[2,16,16], index: 14, kind: output, shape index: {3}]   ;;  %s4481_s15 = inlined_call_operand.vmem [shape: f32[2,1,20], index: 15, kind: output, shape index: {4}]  }
   0x1   :  { %4502 = sst [smem:[#allocation21_spill]] %s4466_s0  ;;  %v21_v0 = vstv %s4476_s10 }
   0x2   :  { %4503 = sst [smem:[#allocation22_spill]] %s4467_s1  ;;  %22 = vst [vmem:[#allocation7] sm:$0x1] %v21_v0 }
   0x3   :  { %4504 = sst [smem:[#allocation23_spill]] %s4468_s2 }
   0x4   :  { %4505 = sst [smem:[#allocation24_spill]] %s4469_s3 }
   0x5   :  { %4506 = sst [smem:[#allocation25_spill]] %s4470_s4 }
   0x6   :  { %4507 = sst [smem:[#allocation26_spill]] %s4471_s5 }
   0x7   :  { %4508 = sst [smem:[#allocation27_spill]] %s4472_s6 }
   0x8   :  { %4509 = sst [smem:[#allocation28_spill]] %s4473_s7 }
   0x9   :  { %4510 = sst [smem:[#allocation29_spill]] %s4474_s8 }
   0xa   :  { %4511 = sst [smem:[#allocation30_spill]] %s4475_s9 }
   0xb   :  { %4512 = sst [smem:[#allocation31_spill]] %s4478_s12 }
   0xc   :  { %23 = vsyncpa [#allocation9], 0 }
   0xd   :  { %25 = vsyncpa [#allocation9 + $0x1], 0 }
   0xe   :  { %26 = vsyncpa [#allocation11], 0 }
   0xf   :  { %28 = vsyncpa [#allocation11 + $0x1], 0 }
  0x10   :  { %29 = vsyncpa [#allocation14], 0 }
  0x11   :  { %31 = vsyncpa [#allocation14 + $0x1], 0  ;;  %s3340_s20 = smov 0   ;;  %s3342_s21 = smov 0  }
  0x12   :  { %s3344_s22 = smov 0   ;;  %s3346_s23 = smov 0  }
  0x13 LB: > { %4513 = sst [smem:[#allocation18_spill]] %s3240_s22  ;;  %s3361_s10 = sadd.s32 4294967295, %s3244_s23   ;;  %s3244_s23 = sphi %s3346_s23, %s4550_s23   ;;  %s3240_s22 = sphi %s3344_s22, %s4552_s22   ;;  %s3236_s21 = sphi %s3342_s21, %s4554_s21   ;;  %s3232_s20 = sphi %s3340_s20, %s4553_s20  }
  0x14   : > { %s4482_s24 = sadd.s32 4294967294, %s3244_s23   ;;  %s3365_s25 = sadd.s32 1, %s3244_s23  }
  0x15   : > { %4514 = sst [smem:[#allocation19_spill]] %s3365_s25  ;;  %s280_s26 = sadd.s32 1, %s3240_s22 }
  0x16   : > { %s277_s27 = ssub.s32 %s3244_s23, %s3365_s25  ;;  %p290_p0 = scmp.ne.s32.totalorder %s3240_s22, %s3236_s21 }
  0x17   : > { %p278_p1 = scmp.eq.s32.totalorder %s277_s27, 0  ;;  %p291_p2 = scmp.eq.s32.totalorder %s3361_s10, 1 }
  0x18   : > { %p296_p3 = scmp.ne.s32.totalorder %s3236_s21, %s3232_s20  ;;  %p297_p4 = scmp.eq.s32.totalorder %s4482_s24, 1 }
  0x19   : > { %s3378_s28 = scalar_select %p278_p1, %s3240_s22, %s280_s26  }
  0x1a   : > { %p3380_p5 = por %p291_p2, %p290_p0  ;;  %p3384_p6 = por %p297_p4, %p296_p3 }
  0x1b   : > { %4515 = sst [smem:[#allocation20_spill]] %s3378_s28  ;;  %p2956_p7 = scmp.ge.s32.totalorder %s3244_s23, 1 }
  0x1c   : > { %p455_p8 = scmp.lt.s32.totalorder %s3244_s23, 3 }
  0x1e   : > { %p456_p9 = pnand %p2956_p7, %p455_p8 }
  0x1f   : > { %p519_p10 = scmp.lt.s32.totalorder (!%p456_p9), %s3361_s10, 1  ;;  %s4518_s0 = sld [smem:[#allocation21_spill]] (!%p456_p9) }
  0x20   : > { %459 = sbr.rel (%p456_p9) target bundleno = 1896 (0x768), region = 64  ;;  %s3247_s26 = smov (!%p456_p9), 127  }
  0x21   : > { %s3248_s27 = smov (!%p456_p9), 2   ;;  %s3249_s24 = smov (!%p456_p9), 126  }
  0x22   : > { %s3250_s28 = smov (!%p456_p9), 1   ;;  %s4519_s1 = sld [smem:[#allocation22_spill]] (!%p456_p9) }
  0x23   : > { %s4520_s2 = sld [smem:[#allocation23_spill]] (!%p456_p9)  ;;  %s3424_s22 = sand.u32 (!%p456_p9), 1, %s3236_s21  }
  0x24   : > { %s2957_s25 = sshll.u32 (!%p456_p9), %s3424_s22, 3  ;;  %s4486_s18 = smov (!%p456_p9), 3  }
  0x25   : > { %vm526_vm0 = vcmask 520192   ;;  %v4488_v1 = vmov 0.0   ;;  %s3393_s16 = scalar_select %p519_p10, %s3361_s10, 1  ;;  %vm540_vm1 = vcmask 516096   ;;  %vm560_vm2 = vcmask 39936  }
  0x26   : > { %527 = vst.msk [vmem:[#allocation2] sm:$0x1f] %vm526_vm0, %v4488_v1  ;;  %vm545_vm3 = vcmask 507904   ;;  %vm533_vm4 = vcmask 516112   ;;  %vm550_vm5 = vcmask 499712   ;;  %vm538_vm6 = vcmask 516104  }
  0x27   : > { %s521_s19 = scalar_lea.vmem %s4518_s0, %s3393_s16  ;;  %v3251_v11 = vmov 0   ;;  %vm564_vm7 = vcmask 1044480   ;;  %vm717_vm8 = vcmask 523264   ;;  %s3431_s17 = scalar_lea.vmem [#allocation8], %s2957_s25  ;;  %vm756_vm10 = vcmask 498688  }
  0x28   : > { %v525_v2 = vld [vmem:[%s521_s19] sm:$0x1]  ;;  %3086 = vset.pattern.permute.xlu2 %v3251_v11  ;;  %3087 = vset.pattern.permute.xlu0 %v3251_v11  ;;  %722 = vst.msk [vmem:[#allocation3 + $0x18] sm:$0xff] %vm717_vm8, %v4488_v1  ;;  %s4521_s4 = sld [smem:[#allocation25_spill]]  ;;  %vm740_vm11 = vcmask 523272   ;;  %vm767_vm12 = vcmask 457728  }
  0x29   : > { %v3089_v3 = vld [vmem:[%s521_s19] ss:$0 sm:$0xff]  ;;  %541 = vst.msk [vmem:[#allocation2 + $0x2] sm:$0x1] %vm540_vm1, %v525_v2  ;;  %3088 = vset.pattern.permute.xlu1 %v3251_v11  ;;  %s3252_s19 = smov 125   ;;  %s4522_s3 = sld [smem:[#allocation24_spill]] }
  0x2a   : > { %542 = vrot.lane.b32.xlu1 %v3089_v3, %s3247_s26  ;;  %530 = vrot.lane.b32.xlu0 %v3089_v3, %s3248_s27  ;;  %v552_v4 = vld [vmem:[%s4519_s1] sm:$0xff]  ;;  %719 = vst.msk [vmem:[#allocation3] sm:$0xff] %vm717_vm8, %v4488_v1  ;;  %vm746_vm13 = vcmask 515072   ;;  %vm751_vm14 = vcmask 506880   ;;  %vm730_vm15 = vcmask 523288   ;;  %vm735_vm0 = vcmask 523280  }
  0x2b   : > { %v562_v5 = vsel %vm560_vm2, %v552_v4, 0  ;;  %v554_v10 = vld [vmem:[%s4520_s2] sm:$0xff]  ;;  %720 = vst.msk [vmem:[#allocation3 + $0x8] sm:$0xff] %vm717_vm8, %v4488_v1  ;;  %s3788_s1 = sshll.u32 %s3424_s22, 4  ;;  %s4532_s6 = sld [smem:[#allocation27_spill]] }
  0x2c   : > { %v585_v8 = vand.u32 4294901760, %v562_v5  ;;  %557 = vperm.xlu2 %3086, %v554_v10   ;;  %721 = vst.msk [vmem:[#allocation3 + $0x10] sm:$0xff] %vm717_vm8, %v4488_v1  ;;  %s3793_s25 = scalar_lea.vmem [#allocation10], %s3788_s1  ;;  %s4533_s5 = sld [smem:[#allocation26_spill]] }
  0x2d   : > { %723 = vst.msk [vmem:[#allocation3 + $0x20] sm:$0xff] %vm717_vm8, %v4488_v1  ;;  %s4126_s2 = scalar_lea.vmem [#allocation12], %s3788_s1  ;;  %s4544_s8 = sld [smem:[#allocation29_spill]] }
  0x2e   : > { %v586_v9 = vsub.f32 %v562_v5, %v585_v8  ;;  %724 = vst.msk [vmem:[#allocation3 + $0x28] sm:$0xff] %vm717_vm8, %v4488_v1  ;;  %v1066_v39 = vld [vmem:[%s4521_s4 + $0x8] sm:$0xff]  ;;  %s4545_s7 = sld [smem:[#allocation28_spill]]  ;;  %s3009_s0 = sshll.u32 %s3361_s10, 3 }
  0x2f   : > { %725 = vst.msk [vmem:[#allocation3 + $0x30] sm:$0xff] %vm717_vm8, %v4488_v1  ;;  %v758_v48 = vld [vmem:[%s4522_s3] sm:$0xff]  ;;  %v759_v56 = vld [vmem:[%s4522_s3 + $0x8] sm:$0xff]  ;;  %s4546_s9 = sld [smem:[#allocation30_spill]] }
  0x30   : > { %v587_v14 = vand.u32 4294901760, %v586_v9  ;;  %v769_v51 = vsel %vm767_vm12, %v758_v48, 0  ;;  %v772_v0 = vsel %vm767_vm12, %v759_v56, 0  ;;  %vm1429_vm12 = vcmask 236544   ;;  %s4547_s12 = sld [smem:[#allocation31_spill]] }
  0x31   : > { %v3457_v53 = vand.u32 4294901760, %v769_v51 }
  0x32   : > { %547 = vrot.lane.b32.xlu1 %v3089_v3, %s3249_s24  ;;  %535 = vrot.lane.b32.xlu0 %v3089_v3, %s3250_s28  ;;  %v588_v15 = vsub.f32 %v586_v9, %v587_v14 }
  0x33   : > { %v3465_v57 = vsub.f32 %v769_v51, %v3457_v53 }
  0x34   : > { %v589_v18 = vand.u32 4294901760, %v588_v15 }
  0x35   : > { %v799_v5 = vand.u32 4294901760, %v3465_v57 }
  0x86   : > { %v558_v24 = vpop.permute.xlu2 %557 }
  0x9c   : > { %v543_v6 = vpop.permute.xlu1 %542  ;;  %v531_v7 = vpop.permute.xlu0 %530 }
  0x9d   : > { %546 = vst.msk [vmem:[#allocation2 + $0x3] sm:$0x1] %vm545_vm3, %v543_v6 }
  0x9e   : > { %534 = vst.msk [vmem:[#allocation2] sm:$0x1] %vm533_vm4, %v531_v7 }
  0xa4   : > { %v548_v12 = vpop.permute.xlu1 %547  ;;  %v536_v13 = vpop.permute.xlu0 %535 }
  0xa5   : > { %551 = vst.msk [vmem:[#allocation2 + $0x4] sm:$0x1] %vm550_vm5, %v548_v12  ;;  %v800_v12 = vsub.f32 %v3465_v57, %v799_v5 }
  0xa6   : > { %539 = vst.msk [vmem:[#allocation2 + $0x1] sm:$0x1] %vm538_vm6, %v536_v13 }
  0xad   : > { %v553_v16 = vld [vmem:[#allocation2] sm:$0x1f] }
  0xae   : > { %v566_v17 = vsel %vm564_vm7, %v553_v16, 0 }
  0xaf   : > { %v583_v19 = vand.u32 4294901760, %v566_v17 }
  0xb1   : > { %584 = vmatpush.msra.mxu0 %v583_v19  ;;  %660 = vmatpush.msra.mxu3 %v583_v19  ;;  %v610_v20 = vsub.f32 %v566_v17, %v583_v19 }
  0xb2   : > { %590 = vmatmul.f32.vlgmr.msra.gmra.mxu0 %v589_v18  ;;  %664 = vmatmul.f32.vlgmr.msra.gmra.mxu3 %v587_v14 }
  0xb3   : > { %637 = vmatpush.msra.mxu2 %v610_v20  ;;  %v611_v21 = vand.u32 4294901760, %v610_v20 }
  0xb4   : > { %640 = vmatmul.f32.vlgmr.msra.gmra.mxu2 %v586_v9 }
  0xb5   : > { %686 = vmatpush.msrb.mxu0 %v611_v21  ;;  %v612_v22 = vsub.f32 %v610_v20, %v611_v21 }
  0xb7   : > { %v613_v23 = vand.u32 4294901760, %v612_v22 }
  0xb9   : > { %614 = vmatpush.msra.mxu1 %v613_v23  ;;  %v801_v23 = vand.u32 4294901760, %v800_v12 }
  0xba   : > { %616 = vmatmul.f32.vlgmr.msra.gmra.mxu1 %v585_v8  ;;  %688 = vmatmul.f32.vlgmr.msrb.gmra.mxu0 %v585_v8 }
  0xbb   : > { %708 = vmatpush.msrb.mxu1 %v583_v19 }
  0xc2   : > { %710 = vmatmul.f32.vlgmr.msrb.gmra.mxu1 %v585_v8  ;;  %v3487_v8 = vand.u32 4294901760, %v772_v0 }
  0xc4   : > { %v806_v17 = vsub.f32 %v772_v0, %v3487_v8 }
 0x12f   : > { %v591_v25 = vpop.f32.mrf.mxu0 }
 0x130   : > { %v592_v26 = vadd.f32 %v591_v25, %v558_v24 }
 0x135   : > { %v665_v30 = vpop.f32.mrf.mxu3 }
 0x137   : > { %v617_v27 = vpop.f32.mrf.mxu1  ;;  %v641_v28 = vpop.f32.mrf.mxu2 }
 0x138   : > { %v618_v29 = vadd.f32 %v617_v27, %v592_v26  ;;  %v689_v32 = vpop.f32.mrf.mxu0 }
 0x13a   : > { %v642_v31 = vadd.f32 %v641_v28, %v618_v29  ;;  %v807_v28 = vand.u32 4294901760, %v806_v17 }
 0x13c   : > { %v666_v33 = vadd.f32 %v665_v30, %v642_v31 }
 0x13e   : > { %v690_v34 = vadd.f32 %v689_v32, %v666_v33 }
 0x13f   : > { %v711_v35 = vpop.f32.mrf.mxu1 }
 0x140   : > { %v712_v36 = vadd.f32 %v711_v35, %v690_v34  ;;  %v808_v35 = vsub.f32 %v806_v17, %v807_v28 }
 0x142   : > { %vm714_vm9 = vcmp.ge.f32.partialorder %v712_v36, 0.0  ;;  %v715_v37 = vmul.f32 0.1, %v712_v36 }
 0x144   : > { %v716_v38 = vsel %vm714_vm9, %v712_v36, %v715_v37 }
 0x145   : > { %742 = vst.msk [vmem:[#allocation3 + $0x18] sm:$0xff] %vm717_vm8, %v716_v38  ;;  %743 = vrot.lane.b32.xlu1 %v716_v38, %s3247_s26  ;;  %748 = vrot.lane.b32.xlu0 %v716_v38, %s3249_s24 }
 0x146   : > { %753 = vrot.lane.b32.xlu2 %v716_v38, %s3252_s19  ;;  %718 = vst.msk [vmem:[%s3431_s17] sm:$0xff] %vm717_vm8, %v716_v38 }
 0x14c   : > { %v763_v52 = vld [vmem:[#allocation3 + $0x18] sm:$0xff] }
 0x14d   : > { %727 = vrot.lane.b32.xlu1 %v716_v38, %s4486_s18  ;;  %732 = vrot.lane.b32.xlu0 %v716_v38, %s3248_s27  ;;  %v3459_v55 = vand.u32 4294901760, %v763_v52  ;;  %s4531_s18 = smov 3  }
 0x14e   : > { %737 = vrot.lane.b32.xlu2 %v716_v38, %s3250_s28  ;;  %v809_v38 = vand.u32 4294901760, %v808_v35 }
 0x14f   : > { %v3475_v3 = vsub.f32 %v763_v52, %v3459_v55 }
 0x151   : > { %v843_v11 = vand.u32 4294901760, %v3475_v3 }
 0x153   : > { %v844_v22 = vsub.f32 %v3475_v3, %v843_v11 }
 0x155   : > { %v845_v30 = vand.u32 4294901760, %v844_v22 }
 0x156   : > { %1074 = vperm.xlu2 %3086, %v1066_v39   ;;  %v1029_v39 = vlaneseq }
 0x1a0   : > { %v754_v40 = vpop.permute.xlu2 %753 }
 0x1a1   : > { %757 = vst.msk [vmem:[#allocation3 + $0x30] sm:$0xff] %vm756_vm10, %v754_v40  ;;  %v1030_v40 = vshrl.u32 %v1029_v39, 7  ;;  %vm1357_vm10 = vcmask 261120  }
 0x1a2   : > { %1366 = vst.msk [vmem:[#allocation4 + $0x30] sm:$0xff] %vm1357_vm10, %v4488_v1 }
 0x1a3   : > { %v3548_v51 = vadd.s32 32, %v1030_v40  ;;  %1360 = vst.msk [vmem:[#allocation4] sm:$0xff] %vm1357_vm10, %v4488_v1 }
 0x1a4   : > { %1361 = vst.msk [vmem:[#allocation4 + $0x8] sm:$0xff] %vm1357_vm10, %v4488_v1 }
 0x1a5   : > { %1362 = vst.msk [vmem:[#allocation4 + $0x10] sm:$0xff] %vm1357_vm10, %v4488_v1 }
 0x1a6   : > { %1363 = vst.msk [vmem:[#allocation4 + $0x18] sm:$0xff] %vm1357_vm10, %v4488_v1 }
 0x1a7   : > { %1364 = vst.msk [vmem:[#allocation4 + $0x20] sm:$0xff] %vm1357_vm10, %v4488_v1 }
 0x1a8   : > { %v738_v41 = vpop.permute.xlu2 %737  ;;  %v766_v42 = vld [vmem:[#allocation3 + $0x30] sm:$0xff]  ;;  %1365 = vst.msk [vmem:[#allocation4 + $0x28] sm:$0xff] %vm1357_vm10, %v4488_v1 }
 0x1a9   : > { %741 = vst.msk [vmem:[#allocation3 + $0x10] sm:$0xff] %vm740_vm11, %v738_v41  ;;  %v3441_v43 = vand.u32 4294901760, %v766_v42  ;;  %v1039_v41 = vand.u32 127, %v1029_v39 }
 0x1aa   : > { %1367 = vst.msk [vmem:[#allocation4 + $0x38] sm:$0xff] %vm1357_vm10, %v4488_v1 }
 0x1ab   : > { %784 = vmatpush.msrb.mxu2 %v3441_v43  ;;  %925 = vmatpush.msra.mxu1 %v3441_v43  ;;  %v3446_v44 = vsub.f32 %v766_v42, %v3441_v43  ;;  %v3520_v42 = vadd.s32 56, %v1030_v40  ;;  %1368 = vst.msk [vmem:[#allocation4 + $0x40] sm:$0xff] %vm1357_vm10, %v4488_v1 }
 0x1ac   : > { %1369 = vst.msk [vmem:[#allocation4 + $0x48] sm:$0xff] %vm1357_vm10, %v4488_v1 }
 0x1ad   : > { %885 = vmatpush.msra.mxu0 %v3446_v44  ;;  %v825_v45 = vand.u32 4294901760, %v3446_v44  ;;  %1370 = vst.msk [vmem:[#allocation4 + $0x50] sm:$0xff] %vm1357_vm10, %v4488_v1 }
 0x1ae   : > { %1371 = vst.msk [vmem:[#allocation4 + $0x58] sm:$0xff] %vm1357_vm10, %v4488_v1 }
 0x1af   : > { %v826_v46 = vsub.f32 %v3446_v44, %v825_v45  ;;  %v3526_v44 = vadd.s32 48, %v1030_v40  ;;  %1372 = vst.msk [vmem:[#allocation4 + $0x60] sm:$0xff] %vm1357_vm10, %v4488_v1 }
 0x1b0   : > { %v762_v54 = vld [vmem:[#allocation3 + $0x10] sm:$0xff]  ;;  %1373 = vst.msk [vmem:[#allocation4 + $0x68] sm:$0xff] %vm1357_vm10, %v4488_v1 }
 0x1b1   : > { %v827_v47 = vand.u32 4294901760, %v826_v46  ;;  %v3467_v61 = vand.u32 4294901760, %v762_v54 }
 0x1b3   : > { %828 = vmatpush.msrb.mxu3 %v827_v47  ;;  %v3485_v7 = vsub.f32 %v762_v54, %v3467_v61  ;;  %v3536_v47 = vadd.s32 40, %v1030_v40 }
 0x1b5   : > { %v849_v16 = vand.u32 4294901760, %v3485_v7 }
 0x1b7   : > { %v744_v49 = vpop.permute.xlu1 %743  ;;  %v749_v50 = vpop.permute.xlu0 %748  ;;  %v850_v27 = vsub.f32 %v3485_v7, %v849_v16 }
 0x1b8   : > { %747 = vst.msk [vmem:[#allocation3 + $0x20] sm:$0xff] %vm746_vm13, %v744_v49  ;;  %vm1420_vm13 = vcmask 244736  }
 0x1b9   : > { %752 = vst.msk [vmem:[#allocation3 + $0x28] sm:$0xff] %vm751_vm14, %v749_v50  ;;  %v851_v32 = vand.u32 4294901760, %v850_v27  ;;  %vm1400_vm14 = vcmask 261128  }
 0x1bf   : > { %v728_v58 = vpop.permute.xlu1 %727  ;;  %v733_v59 = vpop.permute.xlu0 %732  ;;  %v764_v60 = vld [vmem:[#allocation3 + $0x20] sm:$0xff] }
 0x1c0   : > { %731 = vst.msk [vmem:[#allocation3] sm:$0xff] %vm730_vm15, %v728_v58  ;;  %v765_v62 = vld [vmem:[#allocation3 + $0x28] sm:$0xff]  ;;  %v3469_v63 = vand.u32 4294901760, %v764_v60  ;;  %vm1391_vm15 = vcmask 261136  }
 0x1c1   : > { %736 = vst.msk [vmem:[#allocation3 + $0x8] sm:$0xff] %vm735_vm0, %v733_v59  ;;  %v3472_v2 = vand.u32 4294901760, %v765_v62  ;;  %vm1411_vm0 = vcmask 252928  }
 0x1c2   : > { %v3478_v4 = vsub.f32 %v764_v60, %v3469_v63 }
 0x1c3   : > { %786 = vmatpush.msrb.mxu2 %v3472_v2  ;;  %927 = vmatpush.msra.mxu1 %v3472_v2  ;;  %v830_v6 = vsub.f32 %v765_v62, %v3472_v2 }
 0x1c4   : > { %v837_v9 = vand.u32 4294901760, %v3478_v4 }
 0x1c5   : > { %788 = vmatpush.msrb.mxu2 %v3469_v63  ;;  %888 = vmatpush.msra.mxu0 %v830_v6  ;;  %v831_v10 = vand.u32 4294901760, %v830_v6 }
 0x1c6   : > { %929 = vmatpush.msra.mxu1 %v3469_v63  ;;  %v838_v15 = vsub.f32 %v3478_v4, %v837_v9 }
 0x1c7   : > { %790 = vmatpush.msrb.mxu2 %v3459_v55  ;;  %891 = vmatpush.msra.mxu0 %v3478_v4  ;;  %v832_v13 = vsub.f32 %v830_v6, %v831_v10  ;;  %v760_v14 = vld [vmem:[#allocation3] sm:$0xff] }
 0x1c8   : > { %931 = vmatpush.msra.mxu1 %v3459_v55  ;;  %v761_v18 = vld [vmem:[#allocation3 + $0x8] sm:$0xff]  ;;  %v795_v19 = vand.u32 4294901760, %v760_v14  ;;  %v839_v25 = vand.u32 4294901760, %v838_v15 }
 0x1c9   : > { %792 = vmatpush.msrb.mxu2 %v3467_v61  ;;  %894 = vmatpush.msra.mxu0 %v3475_v3  ;;  %v793_v20 = vand.u32 4294901760, %v761_v18  ;;  %v833_v21 = vand.u32 4294901760, %v832_v13 }
 0x1ca   : > { %933 = vmatpush.msra.mxu1 %v3467_v61  ;;  %v860_v24 = vsub.f32 %v760_v14, %v795_v19 }
 0x1cb   : > { %794 = vmatpush.msrb.mxu2 %v793_v20  ;;  %834 = vmatpush.msrb.mxu3 %v833_v21  ;;  %v854_v26 = vsub.f32 %v761_v18, %v793_v20 }
 0x1cc   : > { %897 = vmatpush.msra.mxu0 %v3485_v7  ;;  %935 = vmatpush.msra.mxu1 %v793_v20  ;;  %v861_v29 = vand.u32 4294901760, %v860_v24  ;;  %v1031_v7 = vadd.s32 8, %v1030_v40 }
 0x1cd   : > { %796 = vmatpush.msrb.mxu2 %v795_v19  ;;  %840 = vmatpush.msrb.mxu3 %v839_v25  ;;  %v855_v31 = vand.u32 4294901760, %v854_v26 }
 0x1ce   : > { %900 = vmatpush.msra.mxu0 %v854_v26  ;;  %937 = vmatpush.msra.mxu1 %v795_v19  ;;  %v862_v34 = vsub.f32 %v860_v24, %v861_v29 }
 0x1cf   : > { %802 = vmatmul.f32.vlgmr.msrb.gmra.mxu2 %v801_v23  ;;  %846 = vmatpush.msrb.mxu3 %v845_v30  ;;  %v856_v33 = vsub.f32 %v854_v26, %v855_v31 }
 0x1d0   : > { %963 = vmatpush.msra.mxu2 %v825_v45  ;;  %903 = vmatpush.msra.mxu0 %v860_v24  ;;  %v863_v37 = vand.u32 4294901760, %v862_v34 }
 0x1d1   : > { %852 = vmatpush.msrb.mxu3 %v851_v32  ;;  %v857_v36 = vand.u32 4294901760, %v856_v33  ;;  %906 = vmatmul.f32.vlgmr.msra.gmra.mxu0 %v3465_v57  ;;  %v1033_v57 = vadd.s32 24, %v1030_v40 }
 0x1d2   : > { %967 = vmatpush.msra.mxu2 %v831_v10  ;;  %941 = vmatmul.f32.vlgmr.msra.gmra.mxu1 %v799_v5 }
 0x1d3   : > { %858 = vmatpush.msrb.mxu3 %v857_v36 }
 0x1d4   : > { %971 = vmatpush.msra.mxu2 %v837_v9 }
 0x1d5   : > { %864 = vmatpush.msrb.mxu3 %v863_v37  ;;  %v1065_v37 = vld [vmem:[%s4521_s4] sm:$0xff] }
 0x1d6   : > { %975 = vmatpush.msra.mxu2 %v843_v11  ;;  %866 = vmatmul.f32.vlgmr.msrb.gmra.mxu3 %v3457_v53  ;;  %v4498_v11 = vmov 1.0  }
 0x1d7   : > { %810 = vmatmul.f32.gmra.mxu2 %v809_v38  ;;  %1007 = vmatpush.msra.mxu3 %v3441_v43  ;;  %v3522_v43 = vmul.u32 2, %v1039_v41 }
 0x1d8   : > { %979 = vmatpush.msra.mxu2 %v849_v16  ;;  %1069 = vperm.xlu0 %3087, %v1065_v37  }
 0x1d9   : > { %1009 = vmatpush.msra.mxu3 %v3472_v2  ;;  %911 = vmatmul.f32.gmra.mxu0 %v806_v17  ;;  %vm1048_vm1 = vcmp.eq.s32.totalorder %v3520_v42, %v3522_v43  ;;  %vm1047_vm2 = vcmp.eq.s32.totalorder %v3526_v44, %v3522_v43  ;;  %vm1046_vm3 = vcmp.eq.s32.totalorder %v3536_v47, %v3522_v43 }
 0x1da   : > { %983 = vmatpush.msra.mxu2 %v855_v31  ;;  %947 = vmatmul.f32.gmra.mxu1 %v807_v28  ;;  %v2968_v45 = vsel %vm1048_vm1, 1.0, %v4488_v1  ;;  %v2967_v48 = vsel %vm1047_vm2, 1.0, %v4488_v1  ;;  %v2966_v52 = vsel %vm1046_vm3, 1.0, %v4488_v1  ;;  %vm1045_vm4 = vcmp.eq.s32.totalorder %v3548_v51, %v3522_v43 }
 0x1db   : > { %1011 = vmatpush.msra.mxu3 %v3469_v63  ;;  %v3532_v46 = vsub.f32 %v2968_v45, %v2968_v45  ;;  %v3543_v50 = vsub.f32 %v2967_v48, %v2967_v48  ;;  %v2965_v56 = vsel %vm1045_vm4, 1.0, %v4488_v1  ;;  %vm3575_vm5 = vcmp.eq.s32.totalorder %v1033_v57, %v3522_v43  ;;  %2969 = vmatpush.msk.msrb.mxu0 %vm1048_vm1, %v4498_v11 }
 0x1dc   : > { %987 = vmatpush.msra.mxu2 %v861_v29  ;;  %v1032_v63 = vadd.s32 16, %v1030_v40  ;;  %v2964_v4 = vsel %vm3575_vm5, 1.0, %v4488_v1  ;;  %vm3614_vm7 = vcmp.eq.s32.totalorder %v1031_v7, %v3522_v43  ;;  %vm3623_vm9 = vcmp.eq.s32.totalorder %v1030_v40, %v3522_v43 }
 0x1dd   : > { %1013 = vmatpush.msra.mxu3 %v3459_v55  ;;  %v1134_v49 = vand.u32 4294901760, %v3532_v46  ;;  %v1140_v54 = vand.u32 4294901760, %v3543_v50  ;;  %v3558_v55 = vsub.f32 %v2966_v52, %v2966_v52  ;;  %v3587_v5 = vsub.f32 %v2964_v4, %v2964_v4  ;;  %2970 = vmatpush.msk.msrb.mxu0 %vm1047_vm2, %v4498_v11 }
 0x1de   : > { %870 = vmatmul.f32.gmra.mxu3 %v3487_v8  ;;  %1199 = vmatpush.msrb.mxu2 %v3532_v46  ;;  %vm3590_vm6 = vcmp.eq.s32.totalorder %v1032_v63, %v3522_v43  ;;  %v2962_v16 = vsel %vm3614_vm7, 1.0, %v4488_v1  ;;  %v2961_v21 = vsel %vm3623_vm9, 1.0, %v4488_v1 }
 0x1df   : > { %989 = vmatmul.f32.vlgmr.msra.gmra.mxu2 %v3457_v53  ;;  %1015 = vmatpush.msra.mxu3 %v3467_v61  ;;  %v1141_v59 = vsub.f32 %v3543_v50, %v1140_v54  ;;  %v1146_v60 = vand.u32 4294901760, %v3558_v55  ;;  %v3571_v61 = vsub.f32 %v2965_v56, %v2965_v56  ;;  %v2963_v10 = vsel %vm3590_vm6, 1.0, %v4488_v1 }
 0x1e0   : > { %1202 = vmatpush.msrb.mxu2 %v3543_v50  ;;  %v3609_v12 = vand.u32 4294901760, %v3587_v5  ;;  %v3611_v13 = vsub.f32 %v2963_v10, %v2963_v10  ;;  %v3646_v22 = vsub.f32 %v2961_v21, %v2961_v21  ;;  %2971 = vmatpush.msk.msrb.mxu0 %vm1046_vm3, %v4498_v11 }
 0x1e1   : > { %1017 = vmatpush.msra.mxu3 %v793_v20  ;;  %v1142_v0 = vand.u32 4294901760, %v1141_v59  ;;  %v1147_v2 = vsub.f32 %v3558_v55, %v1146_v60  ;;  %v1152_v3 = vand.u32 4294901760, %v3571_v61  ;;  %v3640_v20 = vsub.f32 %v2962_v16, %v2962_v16 }
 0x1e2   : > { %1205 = vmatpush.msrb.mxu2 %v3558_v55  ;;  %v1159_v18 = vsub.f32 %v3587_v5, %v3609_v12  ;;  %v3664_v26 = vand.u32 4294901760, %v3646_v22  ;;  %2972 = vmatpush.msk.msrb.mxu0 %vm1045_vm4, %v4498_v11 }
 0x1e3   : > { %1019 = vmatpush.msra.mxu3 %v795_v19  ;;  %v1153_v9 = vsub.f32 %v3571_v61, %v1152_v3  ;;  %v3638_v19 = vand.u32 4294901760, %v3611_v13  ;;  %v3661_v25 = vand.u32 4294901760, %v3640_v20 }
 0x1e4   : > { %1208 = vmatpush.msrb.mxu2 %v3571_v61  ;;  %v3648_v23 = vand.u32 4294901760, %v1159_v18  ;;  %v1177_v29 = vsub.f32 %v3646_v22, %v3664_v26  ;;  %2973 = vmatpush.msk.msrb.mxu0 %vm3575_vm5, %v4498_v11 }
 0x1e5   : > { %2977 = vmatpush.msk.msrb.mxu3 %vm1048_vm1, %v4498_v11  ;;  %v1154_v15 = vand.u32 4294901760, %v1153_v9  ;;  %v1165_v24 = vsub.f32 %v3611_v13, %v3638_v19  ;;  %v1171_v28 = vsub.f32 %v3640_v20, %v3661_v25 }
 0x1e6   : > { %1021 = vmatmul.f32.vlgmr.msra.gmra.mxu3 %v3457_v53  ;;  %v1135_v53 = vsub.f32 %v3532_v46, %v1134_v49  ;;  %1211 = vmatpush.msrb.mxu2 %v3587_v5  ;;  %v3689_v31 = vand.u32 4294901760, %v1177_v29 }
 0x1e7   : > { %993 = vmatmul.f32.gmra.mxu2 %v3487_v8  ;;  %2978 = vmatpush.msk.msrb.mxu3 %vm1047_vm2, %v4498_v11  ;;  %v3668_v27 = vand.u32 4294901760, %v1165_v24  ;;  %v3684_v30 = vand.u32 4294901760, %v1171_v28  ;;  %v1075_v24 = vpop.permute.xlu2 %1074 }
 0x1e8   : > { %v1136_v58 = vand.u32 4294901760, %v1135_v53  ;;  %1214 = vmatpush.msrb.mxu2 %v3611_v13  ;;  %2974 = vmatpush.msk.msrb.mxu0 %vm3590_vm6, %v4498_v11 }
 0x1e9   : > { %2979 = vmatpush.msk.msrb.mxu3 %vm1046_vm3, %v4498_v11 }
 0x1ea   : > { %1137 = vmatpush.msrb.mxu1 %v1136_v58  ;;  %1217 = vmatpush.msrb.mxu2 %v3640_v20 }
 0x1eb   : > { %2980 = vmatpush.msk.msrb.mxu3 %vm1045_vm4, %v4498_v11  ;;  %2975 = vmatpush.msk.msrb.mxu0 %vm3614_vm7, %v4498_v11 }
 0x1ec   : > { %1143 = vmatpush.msrb.mxu1 %v1142_v0  ;;  %1220 = vmatpush.msrb.mxu2 %v3646_v22 }
 0x1ed   : > { %2981 = vmatpush.msk.msrb.mxu3 %vm3575_vm5, %v4498_v11  ;;  %2976 = vmatpush.msk.msrb.mxu0 %vm3623_vm9, %v4498_v11 }
 0x1ee   : > { %1025 = vmatmul.f32.gmra.mxu3 %v3487_v8  ;;  %v1148_v8 = vand.u32 4294901760, %v1147_v2 }
 0x1ef   : > { %2982 = vmatpush.msk.msrb.mxu3 %vm3590_vm6, %v4498_v11  ;;  %1280 = vmatpush.msra.mxu0 %v1134_v49 }
 0x1f0   : > { %1149 = vmatpush.msrb.mxu1 %v1148_v8 }
 0x1f1   : > { %2983 = vmatpush.msk.msrb.mxu3 %vm3614_vm7, %v4498_v11  ;;  %1284 = vmatpush.msra.mxu0 %v1140_v54 }
 0x1f2   : > { %1155 = vmatpush.msrb.mxu1 %v1154_v15 }
 0x1f3   : > { %2984 = vmatpush.msk.msrb.mxu3 %vm3623_vm9, %v4498_v11  ;;  %1288 = vmatpush.msra.mxu0 %v1146_v60 }
 0x1f4   : > { %1161 = vmatpush.msrb.mxu1 %v3648_v23 }
 0x1f5   : > { %1292 = vmatpush.msra.mxu0 %v1152_v3 }
 0x1f6   : > { %1167 = vmatpush.msrb.mxu1 %v3668_v27 }
 0x1f7   : > { %1296 = vmatpush.msra.mxu0 %v3609_v12 }
 0x1f8   : > { %1173 = vmatpush.msrb.mxu1 %v3684_v30 }
 0x1f9   : > { %1300 = vmatpush.msra.mxu0 %v3638_v19 }
 0x1fa   : > { %1179 = vmatpush.msrb.mxu1 %v3689_v31 }
 0x1fb   : > { %1304 = vmatpush.msra.mxu0 %v3661_v25 }
 0x1fc   : > { %2985 = vmatpush.msk.msra.mxu1 %vm1048_vm1, %v4498_v11  ;;  %vm1382_vm1 = vcmask 261144  }
 0x1fd   : > { %1308 = vmatpush.msra.mxu0 %v3664_v26 }
 0x1fe   : > { %2986 = vmatpush.msk.msra.mxu1 %vm1047_vm2, %v4498_v11  ;;  %vm1448_vm2 = vcmask 916480  }
 0x200   : > { %2987 = vmatpush.msk.msra.mxu1 %vm1046_vm3, %v4498_v11  ;;  %vm2041_vm3 = vcmask 130048  }
 0x202   : > { %2988 = vmatpush.msk.msra.mxu1 %vm1045_vm4, %v4498_v11 }
 0x204   : > { %2989 = vmatpush.msk.msra.mxu1 %vm3575_vm5, %v4498_v11 }
 0x206   : > { %2990 = vmatpush.msk.msra.mxu1 %vm3590_vm6, %v4498_v11 }
 0x208   : > { %2991 = vmatpush.msk.msra.mxu1 %vm3614_vm7, %v4498_v11 }
 0x20a   : > { %2992 = vmatpush.msk.msra.mxu1 %vm3623_vm9, %v4498_v11 }
 0x24a   : > { %v1070_v8 = vpop.permute.xlu0 %1069 }
 0x24e   : > { %v907_v35 = vpop.f32.mrf.mxu0 }
 0x24f   : > { %v942_v38 = vpop.f32.mrf.mxu1 }
 0x252   : > { %v803_v32 = vpop.f32.mrf.mxu2 }
 0x256   : > { %v912_v44 = vpop.f32.mrf.mxu0 }
 0x257   : > { %v948_v49 = vpop.f32.mrf.mxu1 }
 0x259   : > { %v867_v33 = vpop.f32.mrf.mxu3 }
 0x25a   : > { %v811_v34 = vpop.f32.mrf.mxu2  ;;  %v868_v36 = vadd.f32 %v867_v33, %v803_v32 }
 0x25c   : > { %v908_v40 = vadd.f32 %v907_v35, %v868_v36 }
 0x25e   : > { %v943_v42 = vadd.f32 %v942_v38, %v908_v40 }
 0x261   : > { %v871_v39 = vpop.f32.mrf.mxu3 }
 0x262   : > { %v990_v41 = vpop.f32.mrf.mxu2  ;;  %v872_v43 = vadd.f32 %v871_v39, %v811_v34 }
 0x263   : > { %v991_v45 = vadd.f32 %v990_v41, %v943_v42 }
 0x264   : > { %v913_v47 = vadd.f32 %v912_v44, %v872_v43 }
 0x266   : > { %v949_v53 = vadd.f32 %v948_v49, %v913_v47 }
 0x269   : > { %v1022_v46 = vpop.f32.mrf.mxu3 }
 0x26a   : > { %v1023_v48 = vadd.f32 %v1022_v46, %v991_v45  ;;  %v994_v51 = vpop.f32.mrf.mxu2 }
 0x26b   : > { %v995_v55 = vadd.f32 %v994_v51, %v949_v53  ;;  %v1802_v51 = vld [vmem:[%s4532_s6 + $0x8] sm:$0xff] }
 0x26c   : > { %v1078_v50 = vsel %vm717_vm8, %v1023_v48, 0 }
 0x26d   : > { %v1107_v52 = vand.u32 4294901760, %v1078_v50 }
 0x26f   : > { %v1108_v54 = vsub.f32 %v1078_v50, %v1107_v52  ;;  %1181 = vmatmul.f32.vlgmr.msrb.gmra.mxu1 %v1107_v52 }
 0x271   : > { %v1026_v56 = vpop.f32.mrf.mxu3  ;;  %1223 = vmatmul.f32.vlgmr.msrb.gmra.mxu2 %v1108_v54  ;;  %v1109_v57 = vand.u32 4294901760, %v1108_v54 }
 0x272   : > { %v1027_v58 = vadd.f32 %v1026_v56, %v995_v55 }
 0x273   : > { %1259 = vmatmul.f32.vlgmr.msrb.gmra.mxu3 %v1109_v57  ;;  %v1110_v59 = vsub.f32 %v1108_v54, %v1109_v57 }
 0x274   : > { %v1081_v60 = vsel %vm717_vm8, %v1027_v58, 0 }
 0x275   : > { %v1115_v61 = vand.u32 4294901760, %v1081_v60  ;;  %v1111_v63 = vand.u32 4294901760, %v1110_v59 }
 0x277   : > { %v1116_v0 = vsub.f32 %v1081_v60, %v1115_v61  ;;  %1112 = vmatmul.f32.vlgmr.msrb.gmra.mxu0 %v1111_v63  ;;  %1185 = vmatmul.f32.gmra.mxu1 %v1115_v61 }
 0x279   : > { %1228 = vmatmul.f32.gmra.mxu2 %v1116_v0  ;;  %v1117_v2 = vand.u32 4294901760, %v1116_v0 }
 0x27b   : > { %1265 = vmatmul.f32.gmra.mxu3 %v1117_v2  ;;  %v1118_v3 = vsub.f32 %v1116_v0, %v1117_v2 }
 0x27d   : > { %v1119_v4 = vand.u32 4294901760, %v1118_v3 }
 0x27f   : > { %1120 = vmatmul.f32.gmra.mxu0 %v1119_v4  ;;  %1343 = vmatmul.f32.vlgmr.msra.gmra.mxu1 %v1107_v52 }
 0x287   : > { %1310 = vmatmul.f32.vlgmr.msra.gmra.mxu0 %v1107_v52  ;;  %1347 = vmatmul.f32.gmra.mxu1 %v1115_v61  ;;  %v1801_v52 = vld [vmem:[%s4532_s6] sm:$0xff] }
 0x28f   : > { %1314 = vmatmul.f32.gmra.mxu0 %v1115_v61 }
 0x2ec   : > { %v1182_v7 = vpop.f32.mrf.mxu1 }
 0x2f4   : > { %v1113_v9 = vpop.f32.mrf.mxu0  ;;  %v1186_v15 = vpop.f32.mrf.mxu1 }
 0x2f5   : > { %v1114_v10 = vadd.f32 %v1113_v9, %v1070_v8  ;;  %v1224_v18 = vpop.f32.mrf.mxu2 }
 0x2f6   : > { %v1260_v32 = vpop.f32.mrf.mxu3 }
 0x2f7   : > { %v1183_v16 = vadd.f32 %v1182_v7, %v1114_v10 }
 0x2f9   : > { %v1225_v28 = vadd.f32 %v1224_v18, %v1183_v16 }
 0x2fb   : > { %v1261_v33 = vadd.f32 %v1260_v32, %v1225_v28 }
 0x2fc   : > { %v1121_v21 = vpop.f32.mrf.mxu0  ;;  %v1344_v35 = vpop.f32.mrf.mxu1 }
 0x2fd   : > { %v1122_v29 = vadd.f32 %v1121_v21, %v1075_v24  ;;  %v1229_v38 = vpop.f32.mrf.mxu2 }
 0x2fe   : > { %v1266_v42 = vpop.f32.mrf.mxu3 }
 0x2ff   : > { %v1187_v34 = vadd.f32 %v1186_v15, %v1122_v29 }
 0x301   : > { %v1230_v39 = vadd.f32 %v1229_v38, %v1187_v34 }
 0x303   : > { %v1267_v43 = vadd.f32 %v1266_v42, %v1230_v39 }
 0x304   : > { %v1311_v36 = vpop.f32.mrf.mxu0  ;;  %v1348_v47 = vpop.f32.mrf.mxu1 }
 0x305   : > { %v1312_v37 = vadd.f32 %v1311_v36, %v1261_v33 }
 0x307   : > { %v1345_v40 = vadd.f32 %v1344_v35, %v1312_v37 }
 0x309   : > { %vm1351_vm8 = vcmp.ge.f32.partialorder %v1345_v40, 0.0  ;;  %v1353_v41 = vmul.f32 0.1, %v1345_v40 }
 0x30b   : > { %v1355_v44 = vsel %vm1351_vm8, %v1345_v40, %v1353_v41  ;;  %vm2118_vm8 = vcmask 654336  }
 0x30c   : > { %1403 = vst.msk [vmem:[#allocation4 + $0x30] sm:$0xff] %vm1357_vm10, %v1355_v44  ;;  %v1315_v45 = vpop.f32.mrf.mxu0  ;;  %1423 = vrot.lane.b32.xlu2 %v1355_v44, %s3252_s19 }
 0x30d   : > { %v1316_v46 = vadd.f32 %v1315_v45, %v1267_v43  ;;  %1358 = vst.msk [vmem:[%s3793_s25] sm:$0xff] %vm1357_vm10, %v1355_v44 }
 0x30f   : > { %v1349_v48 = vadd.f32 %v1348_v47, %v1316_v46 }
 0x311   : > { %vm1352_vm11 = vcmp.ge.f32.partialorder %v1349_v48, 0.0  ;;  %v1354_v49 = vmul.f32 0.1, %v1349_v48 }
 0x313   : > { %v1356_v50 = vsel %vm1352_vm11, %v1349_v48, %v1354_v49  ;;  %v1440_v37 = vld [vmem:[#allocation4 + $0x30] sm:$0xff]  ;;  %vm2427_vm11 = vcmask 162816  }
 0x314   : > { %1404 = vst.msk [vmem:[#allocation4 + $0x38] sm:$0xff] %vm1357_vm10, %v1356_v50  ;;  %1414 = vrot.lane.b32.xlu2 %v1355_v44, %s3249_s24  ;;  %1407 = vrot.lane.b32.xlu0 %v1356_v50, %s3247_s26  ;;  %v3869_v42 = vand.u32 4294901760, %v1440_v37 }
 0x315   : > { %1425 = vrot.lane.b32.xlu1 %v1356_v50, %s3252_s19  ;;  %1359 = vst.msk [vmem:[%s3793_s25 + $0x8] sm:$0xff] %vm1357_vm10, %v1356_v50 }
 0x31b   : > { %v1441_v29 = vld [vmem:[#allocation4 + $0x38] sm:$0xff] }
 0x31c   : > { %1396 = vrot.lane.b32.xlu2 %v1356_v50, %s3250_s28  ;;  %1394 = vrot.lane.b32.xlu0 %v1355_v44, %s3250_s28  ;;  %v3861_v38 = vand.u32 4294901760, %v1441_v29 }
 0x31d   : > { %1416 = vrot.lane.b32.xlu1 %v1356_v50, %s3249_s24 }
 0x31e   : > { %v3880_v47 = vsub.f32 %v1441_v29, %v3861_v38  ;;  %v1433_v29 = vld [vmem:[%s4533_s5 + $0x8] sm:$0xff] }
 0x324   : > { %1385 = vrot.lane.b32.xlu2 %v1355_v44, %s3248_s27  ;;  %1378 = vrot.lane.b32.xlu0 %v1356_v50, %s4531_s18 }
 0x325   : > { %1405 = vrot.lane.b32.xlu1 %v1355_v44, %s3247_s26 }
 0x32c   : > { %1810 = vperm.xlu2 %3086, %v1802_v51   ;;  %1805 = vperm.xlu0 %3087, %v1801_v52  }
 0x32d   : > { %1387 = vrot.lane.b32.xlu1 %v1356_v50, %s3248_s27 }
 0x335   : > { %1376 = vrot.lane.b32.xlu1 %v1355_v44, %s4531_s18  ;;  %v1432_v44 = vld [vmem:[%s4533_s5] sm:$0xff] }
 0x336   : > { %v1450_v52 = vsel %vm1448_vm2, %v1432_v44, 0 }
 0x366   : > { %v1424_v53 = vpop.permute.xlu2 %1423 }
 0x367   : > { %1430 = vst.msk [vmem:[#allocation4 + $0x60] sm:$0xff] %vm1429_vm12, %v1424_v53 }
 0x36e   : > { %v1415_v54 = vpop.permute.xlu2 %1414  ;;  %v1446_v59 = vld [vmem:[#allocation4 + $0x60] sm:$0xff] }
 0x36f   : > { %1421 = vst.msk [vmem:[#allocation4 + $0x50] sm:$0xff] %vm1420_vm13, %v1415_v54  ;;  %v3822_v60 = vand.u32 4294901760, %v1446_v59 }
 0x371   : > { %v3825_v63 = vsub.f32 %v1446_v59, %v3822_v60 }
 0x373   : > { %v1512_v10 = vand.u32 4294901760, %v3825_v63 }
 0x375   : > { %v1513_v24 = vsub.f32 %v3825_v63, %v1512_v10 }
 0x376   : > { %v1397_v55 = vpop.permute.xlu2 %1396  ;;  %v1444_v3 = vld [vmem:[#allocation4 + $0x50] sm:$0xff] }
 0x377   : > { %1402 = vst.msk [vmem:[#allocation4 + $0x28] sm:$0xff] %vm1400_vm14, %v1397_v55  ;;  %v3835_v9 = vand.u32 4294901760, %v1444_v3  ;;  %v1514_v39 = vand.u32 4294901760, %v1513_v24  ;;  %v3895_v55 = vsub.f32 %v1440_v37, %v3869_v42 }
 0x379   : > { %v3852_v28 = vsub.f32 %v1444_v3, %v3835_v9 }
 0x37b   : > { %v4497_v41 = vand.u32 4294901760, %v3852_v28 }
 0x37d   : > { %v1525_v50 = vsub.f32 %v3852_v28, %v4497_v41 }
 0x37e   : > { %v1386_v56 = vpop.permute.xlu2 %1385  ;;  %v1439_v43 = vld [vmem:[#allocation4 + $0x28] sm:$0xff] }
 0x37f   : > { %1392 = vst.msk [vmem:[#allocation4 + $0x10] sm:$0xff] %vm1391_vm15, %v1386_v56  ;;  %v3889_v51 = vand.u32 4294901760, %v1439_v43  ;;  %v1526_v3 = vand.u32 4294901760, %v1525_v50  ;;  %v1453_v50 = vsel %vm1448_vm2, %v1433_v29, 0 }
 0x380   : > { %v3960_v1 = vand.u32 4294901760, %v1453_v50 }
 0x386   : > { %v1408_v57 = vpop.permute.xlu0 %1407 }
 0x387   : > { %1413 = vst.msk [vmem:[#allocation4 + $0x48] sm:$0xff] %vm1411_vm0, %v1408_v57  ;;  %v1426_v58 = vpop.permute.xlu1 %1425 }
 0x388   : > { %1431 = vst.msk [vmem:[#allocation4 + $0x68] sm:$0xff] %vm1429_vm12, %v1426_v58 }
 0x38e   : > { %v1395_v61 = vpop.permute.xlu0 %1394  ;;  %v1443_v7 = vld [vmem:[#allocation4 + $0x48] sm:$0xff] }
 0x38f   : > { %1401 = vst.msk [vmem:[#allocation4 + $0x20] sm:$0xff] %vm1400_vm14, %v1395_v61  ;;  %v1417_v0 = vpop.permute.xlu1 %1416  ;;  %v1447_v2 = vld [vmem:[#allocation4 + $0x68] sm:$0xff]  ;;  %v3841_v16 = vand.u32 4294901760, %v1443_v7  ;;  %v4491_v61 = vand.u32 4294901760, %v3880_v47  ;;  %vm2460_vm14 = vcmask 138248  }
 0x390   : > { %1422 = vst.msk [vmem:[#allocation4 + $0x58] sm:$0xff] %vm1420_vm13, %v1417_v0  ;;  %v3828_v4 = vand.u32 4294901760, %v1447_v2  ;;  %v1436_v0 = vld [vmem:[#allocation4 + $0x10] sm:$0xff] }
 0x391   : > { %v3859_v36 = vsub.f32 %v1443_v7, %v3841_v16  ;;  %v3926_v37 = vand.u32 4294901760, %v1436_v0 }
 0x392   : > { %1458 = vmatpush.msra.mxu2 %v3828_v4  ;;  %1655 = vmatpush.msrb.mxu1 %v3828_v4  ;;  %v3833_v8 = vsub.f32 %v1447_v2, %v3828_v4  ;;  %v3907_v2 = vand.u32 4294901760, %v1450_v52 }
 0x393   : > { %v4495_v46 = vand.u32 4294901760, %v3859_v36 }
 0x394   : > { %1460 = vmatpush.msra.mxu2 %v3822_v60  ;;  %1601 = vmatpush.msrb.mxu0 %v3833_v8  ;;  %v1506_v15 = vand.u32 4294901760, %v3833_v8 }
 0x395   : > { %1657 = vmatpush.msrb.mxu1 %v3822_v60  ;;  %v1531_v58 = vsub.f32 %v3859_v36, %v4495_v46 }
 0x396   : > { %1604 = vmatpush.msrb.mxu0 %v3825_v63  ;;  %v1379_v18 = vpop.permute.xlu0 %1378  ;;  %v1507_v21 = vsub.f32 %v3833_v8, %v1506_v15  ;;  %v1438_v48 = vld [vmem:[#allocation4 + $0x20] sm:$0xff]  ;;  %v4535_v63 = vand.u32 4294901760, %v3852_v28 }
 0x397   : > { %1384 = vst.msk [vmem:[#allocation4 + $0x8] sm:$0xff] %vm1382_vm1, %v1379_v18  ;;  %v1406_v32 = vpop.permute.xlu1 %1405  ;;  %v1445_v33 = vld [vmem:[#allocation4 + $0x58] sm:$0xff]  ;;  %v3903_v59 = vand.u32 4294901760, %v1438_v48  ;;  %v3914_v18 = vsub.f32 %v1439_v43, %v3889_v51  ;;  %v3934_v43 = vsub.f32 %v1450_v52, %v3907_v2 }
 0x398   : > { %1412 = vst.msk [vmem:[#allocation4 + $0x40] sm:$0xff] %vm1411_vm0, %v1406_v32  ;;  %v3856_v34 = vand.u32 4294901760, %v1445_v33  ;;  %v1508_v35 = vand.u32 4294901760, %v1507_v21  ;;  %v4490_v21 = vand.u32 4294901760, %v3895_v55  ;;  %v1532_v32 = vand.u32 4294901760, %v1531_v58 }
 0x399   : > { %vm2477_vm0 = vcmask 392192  }
 0x39a   : > { %1462 = vmatpush.msra.mxu2 %v3856_v34  ;;  %1509 = vmatpush.msra.mxu3 %v1508_v35  ;;  %v3865_v40 = vsub.f32 %v1445_v33, %v3856_v34  ;;  %v3924_v35 = vsub.f32 %v1438_v48, %v3903_v59 }
 0x39b   : > { %1659 = vmatpush.msrb.mxu1 %v3856_v34 }
 0x39c   : > { %1464 = vmatpush.msra.mxu2 %v3835_v9  ;;  %1515 = vmatpush.msra.mxu3 %v1514_v39  ;;  %v1518_v45 = vand.u32 4294901760, %v3865_v40  ;;  %v1543_v39 = vsub.f32 %v3880_v47, %v4491_v61  ;;  %v4493_v29 = vand.u32 4294901760, %v3924_v35 }
 0x39d   : > { %1607 = vmatpush.msrb.mxu0 %v3865_v40  ;;  %1661 = vmatpush.msrb.mxu1 %v3835_v9 }
 0x39e   : > { %1466 = vmatpush.msra.mxu2 %v3841_v16  ;;  %v1519_v49 = vsub.f32 %v3865_v40, %v1518_v45  ;;  %v1435_v24 = vld [vmem:[#allocation4 + $0x8] sm:$0xff] }
 0x39f   : > { %1610 = vmatpush.msrb.mxu0 %v3852_v28  ;;  %1663 = vmatpush.msrb.mxu1 %v3841_v16  ;;  %v1388_v53 = vpop.permute.xlu1 %1387  ;;  %v1442_v54 = vld [vmem:[#allocation4 + $0x40] sm:$0xff]  ;;  %v3940_v48 = vand.u32 4294901760, %v1435_v24 }
 0x3a0   : > { %1393 = vst.msk [vmem:[#allocation4 + $0x18] sm:$0xff] %vm1391_vm15, %v1388_v53  ;;  %v3898_v56 = vand.u32 4294901760, %v1442_v54  ;;  %v1520_v57 = vand.u32 4294901760, %v1519_v49  ;;  %v4492_v49 = vand.u32 4294901760, %v3914_v18  ;;  %vm2451_vm15 = vcmask 146448  }
 0x3a1   : > { %1613 = vmatpush.msrb.mxu0 %v3859_v36 }
 0x3a2   : > { %1468 = vmatpush.msra.mxu2 %v3898_v56  ;;  %1521 = vmatpush.msra.mxu3 %v1520_v57  ;;  %v3911_v7 = vsub.f32 %v1442_v54, %v3898_v56  ;;  %v1549_v54 = vsub.f32 %v3895_v55, %v4490_v21  ;;  %v3970_v21 = vsub.f32 %v1435_v24, %v3940_v48 }
 0x3a3   : > { %1665 = vmatpush.msrb.mxu1 %v3898_v56 }
 0x3a4   : > { %1470 = vmatpush.msra.mxu2 %v3861_v38  ;;  %1527 = vmatpush.msra.mxu3 %v1526_v3  ;;  %v4494_v33 = vand.u32 4294901760, %v3911_v7  ;;  %v3954_v3 = vsub.f32 %v1436_v0, %v3926_v37  ;;  %v1555_v0 = vsub.f32 %v3914_v18, %v4492_v49  ;;  %v1550_v61 = vand.u32 4294901760, %v1549_v54 }
 0x3a5   : > { %1616 = vmatpush.msrb.mxu0 %v3911_v7  ;;  %1667 = vmatpush.msrb.mxu1 %v3861_v38  ;;  %v1494_v49 = vsub.f32 %v1453_v50, %v3960_v1 }
 0x3a6   : > { %1472 = vmatpush.msra.mxu2 %v3869_v42  ;;  %1533 = vmatpush.msra.mxu3 %v1532_v32  ;;  %v1537_v44 = vsub.f32 %v3911_v7, %v4494_v33  ;;  %v1487_v32 = vand.u32 4294901760, %v3934_v43  ;;  %v1556_v54 = vand.u32 4294901760, %v1555_v0 }
 0x3a7   : > { %1619 = vmatpush.msrb.mxu0 %v3880_v47  ;;  %1669 = vmatpush.msrb.mxu1 %v3869_v42  ;;  %v1377_v53 = vpop.permute.xlu1 %1376  ;;  %v1437_v52 = vld [vmem:[#allocation4 + $0x18] sm:$0xff] }
 0x3a8   : > { %1383 = vst.msk [vmem:[#allocation4] sm:$0xff] %vm1382_vm1, %v1377_v53  ;;  %1474 = vmatpush.msra.mxu2 %v3889_v51  ;;  %v1538_v57 = vand.u32 4294901760, %v1537_v44  ;;  %v3951_v58 = vand.u32 4294901760, %v1437_v52  ;;  %v1544_v53 = vand.u32 4294901760, %v1543_v39  ;;  %v1561_v39 = vsub.f32 %v3924_v35, %v4493_v29 }
 0x3a9   : > { %1622 = vmatpush.msrb.mxu0 %v3895_v55  ;;  %1671 = vmatpush.msrb.mxu1 %v3889_v51  ;;  %v1488_v24 = vsub.f32 %v3934_v43, %v1487_v32  ;;  %v1578_v29 = vand.u32 4294901760, %v3970_v21  ;;  %vm2442_vm1 = vcmask 154648  }
 0x3aa   : > { %1476 = vmatpush.msra.mxu2 %v3903_v59  ;;  %1539 = vmatpush.msra.mxu3 %v1538_v57  ;;  %v3964_v44 = vsub.f32 %v1437_v52, %v3951_v58  ;;  %v1572_v57 = vand.u32 4294901760, %v3954_v3  ;;  %v1562_v50 = vand.u32 4294901760, %v1561_v39 }
 0x3ab   : > { %1625 = vmatpush.msrb.mxu0 %v3914_v18  ;;  %1673 = vmatpush.msrb.mxu1 %v3903_v59  ;;  %v1489_v0 = vand.u32 4294901760, %v1488_v24  ;;  %v1579_v39 = vsub.f32 %v3970_v21, %v1578_v29 }
 0x3ac   : > { %1478 = vmatpush.msra.mxu2 %v3951_v58  ;;  %1545 = vmatpush.msra.mxu3 %v1544_v53  ;;  %v4496_v52 = vand.u32 4294901760, %v3964_v44 }
 0x3ad   : > { %1628 = vmatpush.msrb.mxu0 %v3924_v35  ;;  %1675 = vmatpush.msrb.mxu1 %v3951_v58 }
 0x3ae   : > { %1480 = vmatpush.msra.mxu2 %v3926_v37  ;;  %1551 = vmatpush.msra.mxu3 %v1550_v61  ;;  %v1567_v53 = vsub.f32 %v3964_v44, %v4496_v52  ;;  %v1573_v61 = vsub.f32 %v3954_v3, %v1572_v57  ;;  %v1495_v52 = vand.u32 4294901760, %v1494_v49 }
 0x3af   : > { %1631 = vmatpush.msrb.mxu0 %v3964_v44  ;;  %1677 = vmatpush.msrb.mxu1 %v3926_v37  ;;  %v1434_v33 = vld [vmem:[#allocation4] sm:$0xff] }
 0x3b0   : > { %1482 = vmatpush.msra.mxu2 %v3940_v48  ;;  %1557 = vmatpush.msra.mxu3 %v1556_v54  ;;  %v3992_v46 = vand.u32 4294901760, %v1434_v33  ;;  %v1568_v41 = vand.u32 4294901760, %v1567_v53  ;;  %v1574_v24 = vand.u32 4294901760, %v1573_v61  ;;  %v1811_v61 = vpop.permute.xlu2 %1810 }
 0x3b1   : > { %1634 = vmatpush.msrb.mxu0 %v3954_v3  ;;  %1679 = vmatpush.msrb.mxu1 %v3940_v48  ;;  %v1806_v3 = vpop.permute.xlu0 %1805 }
 0x3b2   : > { %1484 = vmatpush.msra.mxu2 %v3992_v46  ;;  %1563 = vmatpush.msra.mxu3 %v1562_v50  ;;  %v1583_v11 = vsub.f32 %v1434_v33, %v3992_v46  ;;  %v1496_v50 = vsub.f32 %v1494_v49, %v1495_v52  ;;  %v1580_v33 = vand.u32 4294901760, %v1579_v39 }
 0x3b3   : > { %1637 = vmatpush.msrb.mxu0 %v3970_v21  ;;  %1681 = vmatpush.msrb.mxu1 %v3992_v46 }
 0x3b4   : > { %1700 = vmatpush.msrb.mxu2 %v1506_v15  ;;  %1569 = vmatpush.msra.mxu3 %v1568_v41  ;;  %v1584_v54 = vand.u32 4294901760, %v1583_v11  ;;  %v1497_v15 = vand.u32 4294901760, %v1496_v50  ;;  %v4534_v41 = vmov 1.0  }
 0x3b5   : > { %1640 = vmatpush.msrb.mxu0 %v1583_v11  ;;  %1490 = vmatmul.f32.vlgmr.msra.gmra.mxu2 %v1489_v0 }
 0x3b6   : > { %1704 = vmatpush.msrb.mxu2 %v1512_v10  ;;  %1575 = vmatpush.msra.mxu3 %v1574_v24  ;;  %v1585_v53 = vsub.f32 %v1583_v11, %v1584_v54  ;;  %v4536_v11 = vand.u32 4294901760, %v3859_v36 }
 0x3b7   : > { %1643 = vmatmul.f32.vlgmr.msrb.gmra.mxu0 %v3934_v43  ;;  %1685 = vmatmul.f32.vlgmr.msrb.gmra.mxu1 %v1487_v32  ;;  %v4543_v43 = vmov 0.0  }
 0x3b8   : > { %1708 = vmatpush.msrb.mxu2 %v1518_v45  ;;  %1581 = vmatpush.msra.mxu3 %v1580_v33  ;;  %v1586_v8 = vand.u32 4294901760, %v1585_v53  ;;  %2048 = vst.msk [vmem:[#allocation5 + $0x20] sm:$0xff] %vm2041_vm3, %v4543_v43 }
 0x3b9   : > { %1873 = vmatpush.msra.mxu1 %v3648_v23  ;;  %2993 = vmatpush.msk.msra.mxu0 %vm3575_vm5, %v4534_v41  ;;  %v4537_v23 = vand.u32 4294901760, %v3911_v7  ;;  %2044 = vst.msk [vmem:[#allocation5] sm:$0xff] %vm2041_vm3, %v4543_v43 }
 0x3ba   : > { %1712 = vmatpush.msrb.mxu2 %v4535_v63  ;;  %1587 = vmatpush.msra.mxu3 %v1586_v8  ;;  %2045 = vst.msk [vmem:[#allocation5 + $0x8] sm:$0xff] %vm2041_vm3, %v4543_v43 }
 0x3bb   : > { %1879 = vmatpush.msra.mxu1 %v3668_v27  ;;  %1589 = vmatmul.f32.vlgmr.msra.gmra.mxu3 %v3907_v2  ;;  %v4539_v27 = vand.u32 4294901760, %v3895_v55  ;;  %2046 = vst.msk [vmem:[#allocation5 + $0x10] sm:$0xff] %vm2041_vm3, %v4543_v43 }
 0x3bc   : > { %1765 = vmatpush.msrb.mxu3 %v3828_v4  ;;  %1716 = vmatpush.msrb.mxu2 %v4536_v11  ;;  %v4538_v4 = vand.u32 4294901760, %v3880_v47  ;;  %2047 = vst.msk [vmem:[#allocation5 + $0x18] sm:$0xff] %vm2041_vm3, %v4543_v43 }
 0x3bd   : > { %1498 = vmatmul.f32.gmra.mxu2 %v1497_v15  ;;  %1885 = vmatpush.msra.mxu1 %v3684_v30  ;;  %v4540_v30 = vand.u32 4294901760, %v3914_v18  ;;  %2049 = vst.msk [vmem:[#allocation5 + $0x28] sm:$0xff] %vm2041_vm3, %v4543_v43 }
 0x3be   : > { %1767 = vmatpush.msrb.mxu3 %v3822_v60  ;;  %1720 = vmatpush.msrb.mxu2 %v4537_v23  ;;  %v4542_v60 = vand.u32 4294901760, %v3964_v44  ;;  %2050 = vst.msk [vmem:[#allocation5 + $0x30] sm:$0xff] %vm2041_vm3, %v4543_v43 }
 0x3bf   : > { %1648 = vmatmul.f32.gmra.mxu0 %v1494_v49  ;;  %1691 = vmatmul.f32.gmra.mxu1 %v1495_v52  ;;  %2051 = vst.msk [vmem:[#allocation5 + $0x38] sm:$0xff] %vm2041_vm3, %v4543_v43 }
 0x3c0   : > { %1769 = vmatpush.msrb.mxu3 %v3856_v34  ;;  %1724 = vmatpush.msrb.mxu2 %v4538_v4  ;;  %2052 = vst.msk [vmem:[#allocation5 + $0x40] sm:$0xff] %vm2041_vm3, %v4543_v43 }
 0x3c1   : > { %1891 = vmatpush.msra.mxu1 %v3689_v31  ;;  %2994 = vmatpush.msk.msra.mxu0 %vm3590_vm6, %v4534_v41  ;;  %v4541_v31 = vand.u32 4294901760, %v3924_v35  ;;  %2053 = vst.msk [vmem:[#allocation5 + $0x48] sm:$0xff] %vm2041_vm3, %v4543_v43 }
 0x3c2   : > { %1771 = vmatpush.msrb.mxu3 %v3835_v9  ;;  %1728 = vmatpush.msrb.mxu2 %v4539_v27  ;;  %2433 = vst.msk [vmem:[#allocation6 + $0x28] sm:$0xff] %vm2427_vm11, %v4543_v43 }
 0x3c3   : > { %2997 = vmatpush.msk.msrb.mxu1 %vm3575_vm5, %v4534_v41  ;;  %1593 = vmatmul.f32.gmra.mxu3 %v3960_v1  ;;  %2428 = vst.msk [vmem:[#allocation6] sm:$0xff] %vm2427_vm11, %v4543_v43 }
 0x3c4   : > { %1773 = vmatpush.msrb.mxu3 %v3841_v16  ;;  %1732 = vmatpush.msrb.mxu2 %v4540_v30  ;;  %2429 = vst.msk [vmem:[#allocation6 + $0x8] sm:$0xff] %vm2427_vm11, %v4543_v43 }
 0x3c5   : > { %2995 = vmatpush.msk.msra.mxu0 %vm3614_vm7, %v4534_v41  ;;  %2998 = vmatpush.msk.msrb.mxu1 %vm3590_vm6, %v4534_v41  ;;  %2430 = vst.msk [vmem:[#allocation6 + $0x10] sm:$0xff] %vm2427_vm11, %v4543_v43 }
 0x3c6   : > { %1775 = vmatpush.msrb.mxu3 %v3898_v56  ;;  %1736 = vmatpush.msrb.mxu2 %v4541_v31  ;;  %2431 = vst.msk [vmem:[#allocation6 + $0x18] sm:$0xff] %vm2427_vm11, %v4543_v43 }
 0x3c7   : > { %2996 = vmatpush.msk.msra.mxu0 %vm3623_vm9, %v4534_v41  ;;  %2999 = vmatpush.msk.msrb.mxu1 %vm3614_vm7, %v4534_v41  ;;  %2432 = vst.msk [vmem:[#allocation6 + $0x20] sm:$0xff] %vm2427_vm11, %v4543_v43  ;;  %v2470_v43 = vld [vmem:[#allocation7] sm:$0x1] }
 0x3c8   : > { %1777 = vmatpush.msrb.mxu3 %v3861_v38  ;;  %1740 = vmatpush.msrb.mxu2 %v4542_v60 }
 0x3c9   : > { %1915 = vmatpush.msrb.mxu0 %v3587_v5  ;;  %3000 = vmatpush.msk.msrb.mxu1 %vm3623_vm9, %v4534_v41 }
 0x3ca   : > { %1779 = vmatpush.msrb.mxu3 %v3869_v42  ;;  %1744 = vmatpush.msrb.mxu2 %v1572_v57 }
 0x3cb   : > { %1918 = vmatpush.msrb.mxu0 %v3611_v13 }
 0x3cc   : > { %1781 = vmatpush.msrb.mxu3 %v3889_v51  ;;  %1748 = vmatpush.msrb.mxu2 %v1578_v29 }
 0x3cd   : > { %1921 = vmatpush.msrb.mxu0 %v3640_v20 }
 0x3ce   : > { %1783 = vmatpush.msrb.mxu3 %v3903_v59  ;;  %1752 = vmatpush.msrb.mxu2 %v1584_v54 }
 0x3cf   : > { %1754 = vmatmul.f32.vlgmr.msrb.gmra.mxu2 %v3907_v2  ;;  %1924 = vmatpush.msrb.mxu0 %v3646_v22 }
 0x3d0   : > { %1785 = vmatpush.msrb.mxu3 %v3951_v58  ;;  %1984 = vmatpush.msra.mxu2 %v3609_v12 }
 0x3d2   : > { %1787 = vmatpush.msrb.mxu3 %v3926_v37  ;;  %1988 = vmatpush.msra.mxu2 %v3638_v19 }
 0x3d4   : > { %1789 = vmatpush.msrb.mxu3 %v3940_v48  ;;  %1992 = vmatpush.msra.mxu2 %v3661_v25 }
 0x3d6   : > { %1791 = vmatpush.msrb.mxu3 %v3992_v46  ;;  %1996 = vmatpush.msra.mxu2 %v3664_v26 }
 0x3d7   : > { %1793 = vmatmul.f32.vlgmr.msrb.gmra.mxu3 %v3907_v2  ;;  %1758 = vmatmul.f32.gmra.mxu2 %v3960_v1 }
 0x3d8   : > { %3001 = vmatpush.msk.msra.mxu3 %vm3575_vm5, %v4534_v41 }
 0x3da   : > { %3002 = vmatpush.msk.msra.mxu3 %vm3590_vm6, %v4534_v41  ;;  %vm2091_vm6 = vcmask 113664  }
 0x3dc   : > { %3003 = vmatpush.msk.msra.mxu3 %vm3614_vm7, %v4534_v41  ;;  %vm2071_vm7 = vcmask 130056  }
 0x3de   : > { %3004 = vmatpush.msk.msra.mxu3 %vm3623_vm9, %v4534_v41  ;;  %vm2062_vm9 = vcmask 130064  }
 0x3df   : > { %1797 = vmatmul.f32.gmra.mxu3 %v3960_v1 }
 0x434   : > { %v1644_v19 = vpop.f32.mrf.mxu0  ;;  %v1686_v20 = vpop.f32.mrf.mxu1 }
 0x438   : > { %v1491_v5 = vpop.f32.mrf.mxu2 }
 0x43c   : > { %v1649_v10 = vpop.f32.mrf.mxu0  ;;  %v1692_v17 = vpop.f32.mrf.mxu1 }
 0x43e   : > { %v1590_v12 = vpop.f32.mrf.mxu3 }
 0x43f   : > { %v1591_v62 = vadd.f32 %v1590_v12, %v1491_v5  ;;  %v2107_v12 = vld [vmem:[%s4544_s8 + $0x8] sm:$0xff] }
 0x440   : > { %v1499_v13 = vpop.f32.mrf.mxu2 }
 0x441   : > { %v1645_v25 = vadd.f32 %v1644_v19, %v1591_v62 }
 0x443   : > { %v1687_v26 = vadd.f32 %v1686_v20, %v1645_v25 }
 0x446   : > { %v1594_v22 = vpop.f32.mrf.mxu3 }
 0x447   : > { %v1595_v9 = vadd.f32 %v1594_v22, %v1499_v13 }
 0x449   : > { %v1650_v28 = vadd.f32 %v1649_v10, %v1595_v9 }
 0x44b   : > { %v1693_v40 = vadd.f32 %v1692_v17, %v1650_v28 }
 0x452   : > { %v1755_v6 = vpop.f32.mrf.mxu2 }
 0x453   : > { %v1756_v14 = vadd.f32 %v1755_v6, %v1687_v26  ;;  %v2094_v26 = vld [vmem:[%s4545_s7] sm:$0xff] }
 0x45a   : > { %v1794_v16 = vpop.f32.mrf.mxu3  ;;  %v1759_v1 = vpop.f32.mrf.mxu2 }
 0x45b   : > { %v1795_v34 = vadd.f32 %v1794_v16, %v1756_v14  ;;  %v1760_v45 = vadd.f32 %v1759_v1, %v1693_v40 }
 0x45d   : > { %v1814_v36 = vsel %vm1357_vm10, %v1795_v34, 0 }
 0x45e   : > { %v1839_v38 = vand.u32 4294901760, %v1814_v36 }
 0x460   : > { %v1840_v42 = vsub.f32 %v1814_v36, %v1839_v38  ;;  %1893 = vmatmul.f32.vlgmr.msra.gmra.mxu1 %v1839_v38  ;;  %1998 = vmatmul.f32.vlgmr.msra.gmra.mxu2 %v1839_v38 }
 0x461   : > { %2027 = vmatmul.f32.vlgmr.msra.gmra.mxu3 %v1839_v38  ;;  %v2120_v38 = vsel %vm2118_vm8, %v2094_v26, 0 }
 0x462   : > { %v1841_v46 = vand.u32 4294901760, %v1840_v42  ;;  %v1798_v47 = vpop.f32.mrf.mxu3 }
 0x463   : > { %v1799_v51 = vadd.f32 %v1798_v47, %v1760_v45 }
 0x464   : > { %v1842_v55 = vsub.f32 %v1840_v42, %v1841_v46 }
 0x465   : > { %v1817_v56 = vsel %vm1357_vm10, %v1799_v51, 0  ;;  %vm2082_vm10 = vcmask 121856  }
 0x466   : > { %v1847_v59 = vand.u32 4294901760, %v1817_v56  ;;  %v1843_v2 = vand.u32 4294901760, %v1842_v55  ;;  %v4174_v55 = vand.u32 4294901760, %v2120_v38 }
 0x468   : > { %v1848_v7 = vsub.f32 %v1817_v56, %v1847_v59  ;;  %1844 = vmatmul.f32.vlgmr.msra.gmra.mxu0 %v1843_v2  ;;  %1897 = vmatmul.f32.gmra.mxu1 %v1847_v59 }
 0x469   : > { %2002 = vmatmul.f32.gmra.mxu2 %v1847_v59  ;;  %2031 = vmatmul.f32.gmra.mxu3 %v1847_v59 }
 0x46a   : > { %v1849_v18 = vand.u32 4294901760, %v1848_v7 }
 0x46c   : > { %v1850_v21 = vsub.f32 %v1848_v7, %v1849_v18 }
 0x46e   : > { %v1851_v35 = vand.u32 4294901760, %v1850_v21 }
 0x470   : > { %1852 = vmatmul.f32.gmra.mxu0 %v1851_v35  ;;  %1959 = vmatmul.f32.vlgmr.msrb.gmra.mxu1 %v1841_v46 }
 0x478   : > { %1927 = vmatmul.f32.vlgmr.msrb.gmra.mxu0 %v1840_v42  ;;  %1965 = vmatmul.f32.gmra.mxu1 %v1849_v18 }
 0x480   : > { %1932 = vmatmul.f32.gmra.mxu0 %v1848_v7 }
 0x4dd   : > { %v1894_v37 = vpop.f32.mrf.mxu1 }
 0x4e3   : > { %v1999_v0 = vpop.f32.mrf.mxu2 }
 0x4e4   : > { %v2028_v54 = vpop.f32.mrf.mxu3 }
 0x4e5   : > { %v1845_v48 = vpop.f32.mrf.mxu0  ;;  %v1898_v49 = vpop.f32.mrf.mxu1 }
 0x4e6   : > { %v1846_v29 = vadd.f32 %v1845_v48, %v1806_v3  ;;  %v4202_v3 = vsub.f32 %v2120_v38, %v4174_v55 }
 0x4e8   : > { %v1895_v32 = vadd.f32 %v1894_v37, %v1846_v29  ;;  %v2095_v37 = vld [vmem:[%s4545_s7 + $0x8] sm:$0xff] }
 0x4ec   : > { %v2003_v4 = vpop.f32.mrf.mxu2  ;;  %v2032_v30 = vpop.f32.mrf.mxu3 }
 0x4ed   : > { %v1853_v58 = vpop.f32.mrf.mxu0  ;;  %v1960_v44 = vpop.f32.mrf.mxu1 }
 0x4ee   : > { %v1854_v39 = vadd.f32 %v1853_v58, %v1811_v61  ;;  %v2123_v61 = vsel %vm2118_vm8, %v2095_v37, 0 }
 0x4f0   : > { %v1899_v53 = vadd.f32 %v1898_v49, %v1854_v39 }
 0x4f5   : > { %v1928_v52 = vpop.f32.mrf.mxu0  ;;  %v1966_v63 = vpop.f32.mrf.mxu1 }
 0x4f6   : > { %v1929_v57 = vadd.f32 %v1928_v52, %v1895_v32 }
 0x4f8   : > { %v1961_v24 = vadd.f32 %v1960_v44, %v1929_v57 }
 0x4fa   : > { %v2000_v50 = vadd.f32 %v1999_v0, %v1961_v24 }
 0x4fc   : > { %v2029_v33 = vadd.f32 %v2028_v54, %v2000_v50 }
 0x4fd   : > { %v1933_v8 = vpop.f32.mrf.mxu0 }
 0x4fe   : > { %v2037_v15 = vmul.f32 0.1, %v2029_v33  ;;  %v1934_v41 = vadd.f32 %v1933_v8, %v1899_v53  ;;  %vm2035_vm4 = vcmp.ge.f32.partialorder %v2029_v33, 0.0  ;;  %v2153_v53 = vand.u32 4294901760, %v4202_v3 }
 0x500   : > { %v1967_v11 = vadd.f32 %v1966_v63, %v1934_v41  ;;  %v2039_v23 = vsel %vm2035_vm4, %v2029_v33, %v2037_v15  ;;  %v4232_v63 = vand.u32 4294901760, %v2123_v61 }
 0x501   : > { %2085 = vrot.lane.b32.xlu2 %v2039_v23, %s3249_s24  ;;  %2074 = vst.msk [vmem:[#allocation5 + $0x20] sm:$0xff] %vm2041_vm3, %v2039_v23 }
 0x502   : > { %v2004_v27 = vadd.f32 %v2003_v4, %v1967_v11  ;;  %2042 = vst.msk [vmem:[%s4126_s2] sm:$0xff] %vm2041_vm3, %v2039_v23  ;;  %v2106_v11 = vld [vmem:[%s4544_s8] sm:$0xff] }
 0x504   : > { %v2033_v31 = vadd.f32 %v2032_v30, %v2004_v27 }
 0x506   : > { %v2038_v60 = vmul.f32 0.1, %v2033_v31  ;;  %vm2036_vm5 = vcmp.ge.f32.partialorder %v2033_v31, 0.0 }
 0x508   : > { %v2040_v5 = vsel %vm2036_vm5, %v2033_v31, %v2038_v60  ;;  %v2100_v1 = vld [vmem:[#allocation5 + $0x20] sm:$0xff]  ;;  %v2154_v60 = vsub.f32 %v4202_v3, %v2153_v53 }
 0x509   : > { %2067 = vrot.lane.b32.xlu2 %v2040_v5, %s3250_s28  ;;  %2075 = vst.msk [vmem:[#allocation5 + $0x28] sm:$0xff] %vm2041_vm3, %v2040_v5  ;;  %2078 = vrot.lane.b32.xlu0 %v2040_v5, %s3247_s26  ;;  %v4172_v47 = vand.u32 4294901760, %v2100_v1 }
 0x50a   : > { %2087 = vrot.lane.b32.xlu1 %v2040_v5, %s3249_s24  ;;  %2043 = vst.msk [vmem:[%s4126_s2 + $0x8] sm:$0xff] %vm2041_vm3, %v2040_v5  ;;  %s2699_s24 = sand.u32 1, %s3361_s10  }
 0x50b   : > { %v4199_v58 = vsub.f32 %v2100_v1, %v4172_v47  ;;  %s4374_s4 = scalar_lea.sflag [#allocation11], %s2699_s24 }
 0x50d   : > { %v2206_v33 = vand.u32 4294901760, %v4199_v58 }
 0x50f   : > { %v2207_v31 = vsub.f32 %v4199_v58, %v2206_v33 }
 0x510   : > { %v2101_v17 = vld [vmem:[#allocation5 + $0x28] sm:$0xff] }
 0x511   : > { %2056 = vrot.lane.b32.xlu2 %v2039_v23, %s3248_s27  ;;  %2065 = vrot.lane.b32.xlu0 %v2039_v23, %s3250_s28  ;;  %v4169_v45 = vand.u32 4294901760, %v2101_v17  ;;  %v2208_v26 = vand.u32 4294901760, %v2207_v31  ;;  %v2463_v31 = vld [vmem:[%s4546_s9] sm:$0x1] }
 0x512   : > { %2076 = vrot.lane.b32.xlu1 %v2039_v23, %s3247_s26  ;;  %s4318_s26 = scalar_lea.vmem [#allocation13], %s3788_s1  ;;  %s4365_s1 = sshll.u32 %s3361_s10, 4 }
 0x513   : > { %v4190_v18 = vsub.f32 %v2101_v17, %v4169_v45  ;;  %s2738_s3 = scalar_lea.hbm %s4547_s12, %s4365_s1 }
 0x515   : > { %v2200_v54 = vand.u32 4294901760, %v4190_v18 }
 0x517   : > { %v2201_v4 = vsub.f32 %v4190_v18, %v2200_v54 }
 0x519   : > { %2115 = vperm.xlu0 %3087, %v2107_v12  }
 0x51a   : > { %2058 = vrot.lane.b32.xlu1 %v2040_v5, %s3248_s27 }
 0x522   : > { %2110 = vperm.xlu1 %3088, %v2106_v11  }
 0x55b   : > { %v2086_v13 = vpop.permute.xlu2 %2085 }
 0x55c   : > { %2092 = vst.msk [vmem:[#allocation5 + $0x40] sm:$0xff] %vm2091_vm6, %v2086_v13 }
 0x563   : > { %v2068_v19 = vpop.permute.xlu2 %2067  ;;  %v2104_v25 = vld [vmem:[#allocation5 + $0x40] sm:$0xff] }
 0x564   : > { %2073 = vst.msk [vmem:[#allocation5 + $0x18] sm:$0xff] %vm2071_vm7, %v2068_v19  ;;  %v4146_v6 = vand.u32 4294901760, %v2104_v25 }
 0x566   : > { %v4152_v14 = vsub.f32 %v2104_v25, %v4146_v6 }
 0x568   : > { %v2182_v46 = vand.u32 4294901760, %v4152_v14 }
 0x56a   : > { %v2183_v7 = vsub.f32 %v4152_v14, %v2182_v46 }
 0x56b   : > { %v2057_v62 = vpop.permute.xlu2 %2056  ;;  %v2099_v51 = vld [vmem:[#allocation5 + $0x18] sm:$0xff] }
 0x56c   : > { %2063 = vst.msk [vmem:[#allocation5] sm:$0xff] %vm2062_vm9, %v2057_v62  ;;  %v4192_v21 = vand.u32 4294901760, %v2099_v51  ;;  %v2184_v0 = vand.u32 4294901760, %v2183_v7  ;;  %v2160_v62 = vsub.f32 %v2123_v61, %v4232_v63 }
 0x56e   : > { %v4219_v24 = vsub.f32 %v2099_v51, %v4192_v21  ;;  %v2161_v17 = vand.u32 4294901760, %v2160_v62 }
 0x570   : > { %v2212_v27 = vand.u32 4294901760, %v4219_v24  ;;  %v2162_v7 = vsub.f32 %v2160_v62, %v2161_v17 }
 0x572   : > { %v2213_v25 = vsub.f32 %v4219_v24, %v2212_v27 }
 0x573   : > { %v2096_v57 = vld [vmem:[#allocation5] sm:$0xff] }
 0x574   : > { %v4223_v50 = vand.u32 4294901760, %v2096_v57  ;;  %v2214_v1 = vand.u32 4294901760, %v2213_v25 }
 0x576   : > { %v4254_v5 = vsub.f32 %v2096_v57, %v4223_v50 }
 0x57b   : > { %v2079_v20 = vpop.permute.xlu0 %2078 }
 0x57c   : > { %2084 = vst.msk [vmem:[#allocation5 + $0x38] sm:$0xff] %vm2082_vm10, %v2079_v20  ;;  %v2088_v22 = vpop.permute.xlu1 %2087  ;;  %v2202_v20 = vand.u32 4294901760, %v2201_v4 }
 0x57d   : > { %2093 = vst.msk [vmem:[#allocation5 + $0x48] sm:$0xff] %vm2091_vm6, %v2088_v22 }
 0x583   : > { %v2066_v9 = vpop.permute.xlu0 %2065  ;;  %v2103_v10 = vld [vmem:[#allocation5 + $0x38] sm:$0xff] }
 0x584   : > { %2072 = vst.msk [vmem:[#allocation5 + $0x10] sm:$0xff] %vm2071_vm7, %v2066_v9  ;;  %v2077_v16 = vpop.permute.xlu1 %2076  ;;  %v2105_v28 = vld [vmem:[#allocation5 + $0x48] sm:$0xff]  ;;  %v4155_v34 = vand.u32 4294901760, %v2103_v10  ;;  %v2230_v9 = vand.u32 4294901760, %v4254_v5 }
 0x585   : > { %2083 = vst.msk [vmem:[#allocation5 + $0x30] sm:$0xff] %vm2082_vm10, %v2077_v16  ;;  %v4158_v36 = vand.u32 4294901760, %v2105_v28 }
 0x586   : > { %v4162_v40 = vsub.f32 %v2103_v10, %v4155_v34  ;;  %v2155_v10 = vand.u32 4294901760, %v2154_v60  ;;  %v2479_v60 = vsel %vm2477_vm0, %v2463_v31, 0 }
 0x587   : > { %2132 = vmatpush.msra.mxu0 %v4158_v36  ;;  %2297 = vmatpush.msrb.mxu3 %v4158_v36  ;;  %v4167_v42 = vsub.f32 %v2105_v28, %v4158_v36 }
 0x588   : > { %v2188_v59 = vand.u32 4294901760, %v4162_v40 }
 0x589   : > { %2134 = vmatpush.msra.mxu0 %v4146_v6  ;;  %2251 = vmatpush.msrb.mxu2 %v4167_v42  ;;  %v2176_v56 = vand.u32 4294901760, %v4167_v42 }
 0x58a   : > { %2299 = vmatpush.msrb.mxu3 %v4146_v6  ;;  %v2189_v44 = vsub.f32 %v4162_v40, %v2188_v59 }
 0x58b   : > { %2136 = vmatpush.msra.mxu0 %v4155_v34  ;;  %2254 = vmatpush.msrb.mxu2 %v4152_v14  ;;  %v2177_v2 = vsub.f32 %v4167_v42, %v2176_v56  ;;  %v2098_v35 = vld [vmem:[#allocation5 + $0x10] sm:$0xff] }
 0x58c   : > { %2301 = vmatpush.msrb.mxu3 %v4155_v34  ;;  %v2059_v48 = vpop.permute.xlu1 %2058  ;;  %v2102_v49 = vld [vmem:[#allocation5 + $0x30] sm:$0xff]  ;;  %v4211_v52 = vand.u32 4294901760, %v2098_v35  ;;  %v2190_v8 = vand.u32 4294901760, %v2189_v44 }
 0x58d   : > { %2064 = vst.msk [vmem:[#allocation5 + $0x8] sm:$0xff] %vm2062_vm9, %v2059_v48  ;;  %2257 = vmatpush.msrb.mxu2 %v4162_v40  ;;  %v4206_v29 = vand.u32 4294901760, %v2102_v49  ;;  %v2178_v32 = vand.u32 4294901760, %v2177_v2  ;;  %v2231_v2 = vsub.f32 %v4254_v5, %v2230_v9  ;;  %v2163_v48 = vand.u32 4294901760, %v2162_v7 }
 0x58e   : > { %v4230_v41 = vsub.f32 %v2098_v35, %v4211_v52 }
 0x58f   : > { %2138 = vmatpush.msra.mxu0 %v4206_v29  ;;  %2179 = vmatpush.msra.mxu1 %v2178_v32  ;;  %v4216_v39 = vsub.f32 %v2102_v49, %v4206_v29  ;;  %v2232_v37 = vand.u32 4294901760, %v2231_v2 }
 0x590   : > { %2303 = vmatpush.msrb.mxu3 %v4206_v29  ;;  %v2218_v19 = vand.u32 4294901760, %v4230_v41 }
 0x591   : > { %2140 = vmatpush.msra.mxu0 %v4169_v45  ;;  %2185 = vmatpush.msra.mxu1 %v2184_v0  ;;  %v2194_v15 = vand.u32 4294901760, %v4216_v39 }
 0x592   : > { %2260 = vmatpush.msrb.mxu2 %v4216_v39  ;;  %2305 = vmatpush.msrb.mxu3 %v4169_v45  ;;  %v2219_v16 = vsub.f32 %v4230_v41, %v2218_v19 }
 0x593   : > { %2142 = vmatpush.msra.mxu0 %v4172_v47  ;;  %2191 = vmatpush.msra.mxu1 %v2190_v8  ;;  %v2195_v23 = vsub.f32 %v4216_v39, %v2194_v15 }
 0x594   : > { %2263 = vmatpush.msrb.mxu2 %v4190_v18  ;;  %2307 = vmatpush.msrb.mxu3 %v4172_v47  ;;  %v2097_v30 = vld [vmem:[#allocation5 + $0x8] sm:$0xff]  ;;  %v2220_v51 = vand.u32 4294901760, %v2219_v16 }
 0x595   : > { %2144 = vmatpush.msra.mxu0 %v4192_v21  ;;  %v2196_v12 = vand.u32 4294901760, %v2195_v23  ;;  %v4257_v13 = vand.u32 4294901760, %v2097_v30 }
 0x596   : > { %2266 = vmatpush.msrb.mxu2 %v4199_v58  ;;  %2309 = vmatpush.msrb.mxu3 %v4192_v21 }
 0x597   : > { %2146 = vmatpush.msra.mxu0 %v4211_v52  ;;  %2197 = vmatpush.msra.mxu1 %v2196_v12  ;;  %v2223_v22 = vsub.f32 %v2097_v30, %v4257_v13 }
 0x598   : > { %2269 = vmatpush.msrb.mxu2 %v4219_v24  ;;  %2311 = vmatpush.msrb.mxu3 %v4211_v52 }
 0x599   : > { %2148 = vmatpush.msra.mxu0 %v4257_v13  ;;  %2203 = vmatpush.msra.mxu1 %v2202_v20  ;;  %v2224_v28 = vand.u32 4294901760, %v2223_v22  ;;  %v2503_v20 = vand.u32 4294901760, %v2479_v60 }
 0x59a   : > { %2272 = vmatpush.msrb.mxu2 %v4230_v41  ;;  %2313 = vmatpush.msrb.mxu3 %v4257_v13 }
 0x59b   : > { %2150 = vmatpush.msra.mxu0 %v4223_v50  ;;  %2209 = vmatpush.msra.mxu1 %v2208_v26  ;;  %v2225_v38 = vsub.f32 %v2223_v22, %v2224_v28 }
 0x59c   : > { %2275 = vmatpush.msrb.mxu2 %v2223_v22  ;;  %2315 = vmatpush.msrb.mxu3 %v4223_v50 }
 0x59d   : > { %2156 = vmatmul.f32.vlgmr.msra.gmra.mxu0 %v2155_v10  ;;  %2215 = vmatpush.msra.mxu1 %v2214_v1  ;;  %v2226_v35 = vand.u32 4294901760, %v2225_v38 }
 0x59e   : > { %2338 = vmatpush.msrb.mxu0 %v2176_v56  ;;  %2278 = vmatpush.msrb.mxu2 %v4254_v5 }
 0x59f   : > { %2221 = vmatpush.msra.mxu1 %v2220_v51  ;;  %2281 = vmatmul.f32.vlgmr.msrb.gmra.mxu2 %v4202_v3 }
 0x5a0   : > { %2342 = vmatpush.msrb.mxu0 %v2182_v46  ;;  %2319 = vmatmul.f32.vlgmr.msrb.gmra.mxu3 %v2153_v53 }
 0x5a1   : > { %2227 = vmatpush.msra.mxu1 %v2226_v35 }
 0x5a2   : > { %2346 = vmatpush.msrb.mxu0 %v2188_v59  ;;  %v2116_v59 = vpop.permute.xlu0 %2115 }
 0x5a3   : > { %2233 = vmatpush.msra.mxu1 %v2232_v37 }
 0x5a4   : > { %2350 = vmatpush.msrb.mxu0 %v2194_v15  ;;  %2235 = vmatmul.f32.vlgmr.msra.gmra.mxu1 %v4174_v55 }
 0x5a5   : > { %2164 = vmatmul.f32.gmra.mxu0 %v2163_v48  ;;  %2391 = vmatpush.msrb.mxu1 %v4158_v36 }
 0x5a6   : > { %2354 = vmatpush.msrb.mxu0 %v2200_v54 }
 0x5a7   : > { %2393 = vmatpush.msrb.mxu1 %v4146_v6  ;;  %2286 = vmatmul.f32.gmra.mxu2 %v2160_v62 }
 0x5a8   : > { %2358 = vmatpush.msrb.mxu0 %v2206_v33  ;;  %2325 = vmatmul.f32.gmra.mxu3 %v2161_v17 }
 0x5a9   : > { %2395 = vmatpush.msrb.mxu1 %v4155_v34  ;;  %v2111_v34 = vpop.permute.xlu1 %2110 }
 0x5aa   : > { %2362 = vmatpush.msrb.mxu0 %v2212_v27 }
 0x5ab   : > { %2397 = vmatpush.msrb.mxu1 %v4206_v29 }
 0x5ac   : > { %2366 = vmatpush.msrb.mxu0 %v2218_v19  ;;  %2239 = vmatmul.f32.gmra.mxu1 %v4232_v63 }
 0x5ad   : > { %2399 = vmatpush.msrb.mxu1 %v4169_v45 }
 0x5ae   : > { %2370 = vmatpush.msrb.mxu0 %v2224_v28 }
 0x5af   : > { %2401 = vmatpush.msrb.mxu1 %v4172_v47 }
 0x5b0   : > { %2374 = vmatpush.msrb.mxu0 %v2230_v9  ;;  %v4351_v9 = vsub.f32 %v2479_v60, %v2503_v20 }
 0x5b1   : > { %2376 = vmatmul.f32.vlgmr.msrb.gmra.mxu0 %v4174_v55  ;;  %2403 = vmatpush.msrb.mxu1 %v4192_v21 }
 0x5b2   : > { %v2505_v2 = vand.u32 4294901760, %v4351_v9 }
 0x5b3   : > { %2405 = vmatpush.msrb.mxu1 %v4211_v52 }
 0x5b5   : > { %2407 = vmatpush.msrb.mxu1 %v4257_v13 }
 0x5b7   : > { %2409 = vmatpush.msrb.mxu1 %v4223_v50 }
 0x5b8   : > { %2411 = vmatmul.f32.vlgmr.msrb.gmra.mxu1 %v4174_v55 }
 0x5b9   : > { %2380 = vmatmul.f32.gmra.mxu0 %v4232_v63 }
 0x5c0   : > { %2415 = vmatmul.f32.gmra.mxu1 %v4232_v63 }
 0x61a   : > { %v2157_v6 = vpop.f32.mrf.mxu0 }
 0x61b   : > { %v2158_v36 = vadd.f32 %v2157_v6, %v2111_v34 }
 0x621   : > { %v2236_v14 = vpop.f32.mrf.mxu1 }
 0x622   : > { %v2165_v40 = vpop.f32.mrf.mxu0  ;;  %v2282_v42 = vpop.f32.mrf.mxu2  ;;  %v2237_v45 = vadd.f32 %v2236_v14, %v2158_v36  ;;  %v2506_v14 = vsub.f32 %v4351_v9, %v2505_v2 }
 0x623   : > { %v2320_v46 = vpop.f32.mrf.mxu3  ;;  %v2166_v21 = vadd.f32 %v2165_v40, %v2116_v59 }
 0x624   : > { %v2283_v56 = vadd.f32 %v2282_v42, %v2237_v45 }
 0x626   : > { %v2321_v49 = vadd.f32 %v2320_v46, %v2283_v56 }
 0x629   : > { %v2240_v47 = vpop.f32.mrf.mxu1 }
 0x62a   : > { %v2241_v58 = vadd.f32 %v2240_v47, %v2166_v21  ;;  %v2287_v55 = vpop.f32.mrf.mxu2  ;;  %v2507_v47 = vand.u32 4294901760, %v2506_v14 }
 0x62b   : > { %v2326_v52 = vpop.f32.mrf.mxu3 }
 0x62c   : > { %v2288_v32 = vadd.f32 %v2287_v55, %v2241_v58 }
 0x62e   : > { %v2377_v18 = vpop.f32.mrf.mxu0  ;;  %v2327_v0 = vadd.f32 %v2326_v52, %v2288_v32 }
 0x62f   : > { %v2378_v3 = vadd.f32 %v2377_v18, %v2321_v49 }
 0x635   : > { %v2412_v29 = vpop.f32.mrf.mxu1 }
 0x636   : > { %v2413_v44 = vadd.f32 %v2412_v29, %v2378_v3  ;;  %v2381_v61 = vpop.f32.mrf.mxu0 }
 0x637   : > { %v2382_v24 = vadd.f32 %v2381_v61, %v2327_v0 }
 0x638   : > { %vm2419_vm12 = vcmp.ge.f32.partialorder %v2413_v44, 0.0  ;;  %v2421_v57 = vmul.f32 0.1, %v2413_v44 }
 0x63a   : > { %v2423_v39 = vsel %vm2419_vm12, %v2413_v44, %v2421_v57 }
 0x63b   : > { %2454 = vrot.lane.b32.xlu0 %v2423_v39, %s3250_s28  ;;  %2425 = vst.msk [vmem:[%s4318_s26] sm:$0xff] %vm2041_vm3, %v2423_v39 }
 0x63d   : > { %v2416_v54 = vpop.f32.mrf.mxu1 }
 0x63e   : > { %v2417_v50 = vadd.f32 %v2416_v54, %v2382_v24 }
 0x640   : > { %vm2420_vm13 = vcmp.ge.f32.partialorder %v2417_v50, 0.0  ;;  %v2422_v33 = vmul.f32 0.1, %v2417_v50 }
 0x642   : > { %v2424_v53 = vsel %vm2420_vm13, %v2417_v50, %v2422_v33 }
 0x643   : > { %2447 = vrot.lane.b32.xlu1 %v2424_v53, %s3248_s27  ;;  %2426 = vst.msk [vmem:[%s4318_s26 + $0x8] sm:$0xff] %vm2041_vm3, %v2424_v53  ;;  %2456 = vrot.lane.b32.xlu2 %v2424_v53, %s3250_s28  ;;  %s2739_s28 = sshll.u32 %s3793_s25, 4  ;;  %s2740_s28 = int_to_ptr.vmem [resolvable:$true] %s2739_s28 }
 0x644   : > { %2438 = vrot.lane.b32.xlu0 %v2424_v53, %s4531_s18 }
 0x64b   : > { %2436 = vrot.lane.b32.xlu1 %v2423_v39, %s4531_s18  ;;  %2445 = vrot.lane.b32.xlu2 %v2423_v39, %s3248_s27  ;;  %s2741_s27 = sshll.u32 %s2738_s3, 4  ;;  %s3110_s18 = scalar_lea.hbm %s4547_s12, 32  ;;  %s2742_s27 = int_to_ptr.hbm [resolvable:$true] %s2741_s27 }
 0x64c   : > { %s3104_s5 = sshra.s32 %s2742_s27, 4  ;;  %s3105_s5 = int_to_ptr.hbm [resolvable:$true] %s3104_s5 }
 0x64d   : > { %s3106_s6 = scalar_lea.hbm %s3105_s5, 16  ;;  %p3111_p0 = scmp.lt.s32.totalorder %s3105_s5, %s4547_s12 }
 0x64e   : > { %p3107_p11 = scmp.ne.s32.totalorder %s3105_s5, %s3106_s6  ;;  %p3112_p1 = scmp.lt.s32.totalorder %s3110_s18, %s3106_s6 }
 0x650   : > { %p3108_p12 = pnand %p3107_p11, %p3380_p5  ;;  %p3113_p2 = por %p3112_p1, %p3111_p0 }
 0x652   : > { %p3109_p13 = pneg %p3108_p12 }
 0x653   : > { %2473 = vperm.xlu2 %3086, %v2470_v43  }
 0x654   : > { %p3114_p3 = pnand %p3113_p2, %p3109_p13 }
 0x69d   : > { %v2457_v8 = vpop.permute.xlu2 %2456 }
 0x69e   : > { %2462 = vst.msk [vmem:[#allocation6 + $0x28] sm:$0xff] %vm2460_vm14, %v2457_v8 }
 0x6a5   : > { %v2446_v15 = vpop.permute.xlu2 %2445  ;;  %v2469_v41 = vld [vmem:[#allocation6 + $0x28] sm:$0xff] }
 0x6a6   : > { %2452 = vst.msk [vmem:[#allocation6 + $0x10] sm:$0xff] %vm2451_vm15, %v2446_v15  ;;  %v4330_v63 = vand.u32 4294901760, %v2469_v41 }
 0x6a8   : > { %2492 = vmatpush.msra.mxu2 %v4330_v63  ;;  %v4334_v11 = vsub.f32 %v2469_v41, %v4330_v63  ;;  %2676 = vmatpush.msra.mxu1 %v4330_v63 }
 0x6aa   : > { %v2524_v23 = vand.u32 4294901760, %v4334_v11 }
 0x6ac   : > { %2639 = vmatpush.msra.mxu0 %v2524_v23  ;;  %v2525_v4 = vsub.f32 %v4334_v11, %v2524_v23 }
 0x6ad   : > { %v2455_v27 = vpop.permute.xlu0 %2454  ;;  %v2466_v13 = vld [vmem:[#allocation6 + $0x10] sm:$0xff] }
 0x6ae   : > { %2461 = vst.msk [vmem:[#allocation6 + $0x20] sm:$0xff] %vm2460_vm14, %v2455_v27  ;;  %v2526_v30 = vand.u32 4294901760, %v2525_v4  ;;  %v4349_v25 = vand.u32 4294901760, %v2466_v13 }
 0x6b0   : > { %2527 = vmatpush.msra.mxu3 %v2526_v30  ;;  %v2541_v16 = vsub.f32 %v2466_v13, %v4349_v25 }
 0x6b2   : > { %v2542_v37 = vand.u32 4294901760, %v2541_v16 }
 0x6b4   : > { %v2543_v40 = vsub.f32 %v2541_v16, %v2542_v37 }
 0x6b5   : > { %v2448_v5 = vpop.permute.xlu1 %2447  ;;  %v2468_v12 = vld [vmem:[#allocation6 + $0x20] sm:$0xff] }
 0x6b6   : > { %2453 = vst.msk [vmem:[#allocation6 + $0x18] sm:$0xff] %vm2451_vm15, %v2448_v5  ;;  %v2439_v19 = vpop.permute.xlu0 %2438  ;;  %v4343_v62 = vand.u32 4294901760, %v2468_v12  ;;  %v2544_v59 = vand.u32 4294901760, %v2543_v40 }
 0x6b7   : > { %2444 = vst.msk [vmem:[#allocation6 + $0x8] sm:$0xff] %vm2442_vm1, %v2439_v19 }
 0x6b8   : > { %2494 = vmatpush.msra.mxu2 %v4343_v62  ;;  %2678 = vmatpush.msra.mxu1 %v4343_v62  ;;  %v2529_v22 = vsub.f32 %v2468_v12, %v4343_v62 }
 0x6ba   : > { %v2530_v26 = vand.u32 4294901760, %v2529_v22 }
 0x6bc   : > { %2643 = vmatpush.msra.mxu0 %v2530_v26  ;;  %v2531_v10 = vsub.f32 %v2529_v22, %v2530_v26 }
 0x6bd   : > { %v2437_v28 = vpop.permute.xlu1 %2436  ;;  %v2467_v17 = vld [vmem:[#allocation6 + $0x18] sm:$0xff] }
 0x6be   : > { %2443 = vst.msk [vmem:[#allocation6] sm:$0xff] %vm2442_vm1, %v2437_v28  ;;  %v2495_v1 = vand.u32 4294901760, %v2467_v17  ;;  %v2532_v38 = vand.u32 4294901760, %v2531_v10  ;;  %v2465_v51 = vld [vmem:[#allocation6 + $0x8] sm:$0xff] }
 0x6bf   : > { %v2499_v7 = vand.u32 4294901760, %v2465_v51 }
 0x6c0   : > { %2496 = vmatpush.msra.mxu2 %v2495_v1  ;;  %2533 = vmatpush.msra.mxu3 %v2532_v38  ;;  %v2535_v35 = vsub.f32 %v2467_v17, %v2495_v1 }
 0x6c1   : > { %2680 = vmatpush.msra.mxu1 %v2495_v1  ;;  %v2547_v48 = vsub.f32 %v2465_v51, %v2499_v7 }
 0x6c2   : > { %2498 = vmatpush.msra.mxu2 %v4349_v25  ;;  %v2536_v6 = vand.u32 4294901760, %v2535_v35 }
 0x6c3   : > { %2682 = vmatpush.msra.mxu1 %v4349_v25  ;;  %v2548_v34 = vand.u32 4294901760, %v2547_v48 }
 0x6c4   : > { %2500 = vmatpush.msra.mxu2 %v2499_v7  ;;  %2647 = vmatpush.msra.mxu0 %v2536_v6  ;;  %v2537_v36 = vsub.f32 %v2535_v35, %v2536_v6 }
 0x6c5   : > { %2684 = vmatpush.msra.mxu1 %v2499_v7  ;;  %v2464_v42 = vld [vmem:[#allocation6] sm:$0xff]  ;;  %v2549_v56 = vsub.f32 %v2547_v48, %v2548_v34 }
 0x6c6   : > { %2651 = vmatpush.msra.mxu0 %v2542_v37  ;;  %v2501_v45 = vand.u32 4294901760, %v2464_v42  ;;  %v2538_v46 = vand.u32 4294901760, %v2537_v36 }
 0x6c7   : > { %v2550_v21 = vand.u32 4294901760, %v2549_v56 }
 0x6c8   : > { %2502 = vmatpush.msra.mxu2 %v2501_v45  ;;  %2539 = vmatpush.msra.mxu3 %v2538_v46  ;;  %v2553_v18 = vsub.f32 %v2464_v42, %v2501_v45 }
 0x6c9   : > { %2655 = vmatpush.msra.mxu0 %v2548_v34  ;;  %2686 = vmatpush.msra.mxu1 %v2501_v45 }
 0x6ca   : > { %2508 = vmatmul.f32.vlgmr.msra.gmra.mxu2 %v2507_v47  ;;  %2545 = vmatpush.msra.mxu3 %v2544_v59  ;;  %v2554_v49 = vand.u32 4294901760, %v2553_v18 }
 0x6cb   : > { %2575 = vmatpush.msrb.mxu2 %v4334_v11  ;;  %2688 = vmatmul.f32.vlgmr.msra.gmra.mxu1 %v2503_v20 }
 0x6cc   : > { %2551 = vmatpush.msra.mxu3 %v2550_v21  ;;  %2659 = vmatpush.msra.mxu0 %v2554_v49  ;;  %v2555_v58 = vsub.f32 %v2553_v18, %v2554_v49 }
 0x6cd   : > { %2578 = vmatpush.msrb.mxu2 %v2529_v22  ;;  %2661 = vmatmul.f32.vlgmr.msra.gmra.mxu0 %v2503_v20 }
 0x6ce   : > { %v2556_v55 = vand.u32 4294901760, %v2555_v58 }
 0x6cf   : > { %2581 = vmatpush.msrb.mxu2 %v2535_v35 }
 0x6d0   : > { %2557 = vmatpush.msra.mxu3 %v2556_v55 }
 0x6d1   : > { %2584 = vmatpush.msrb.mxu2 %v2541_v16  ;;  %2559 = vmatmul.f32.vlgmr.msra.gmra.mxu3 %v2503_v20 }
 0x6d2   : > { %2608 = vmatpush.msrb.mxu3 %v4330_v63 }
 0x6d3   : > { %2587 = vmatpush.msrb.mxu2 %v2547_v48 }
 0x6d4   : > { %2610 = vmatpush.msrb.mxu3 %v4343_v62 }
 0x6d5   : > { %2590 = vmatpush.msrb.mxu2 %v2553_v18 }
 0x6d6   : > { %2593 = vmatmul.f32.vlgmr.msrb.gmra.mxu2 %v4351_v9  ;;  %2612 = vmatpush.msrb.mxu3 %v2495_v1 }
 0x6d8   : > { %2614 = vmatpush.msrb.mxu3 %v4349_v25 }
 0x6da   : > { %2616 = vmatpush.msrb.mxu3 %v2499_v7 }
 0x6dc   : > { %2618 = vmatpush.msrb.mxu3 %v2501_v45 }
 0x6dd   : > { %2622 = vmatmul.f32.vlgmr.msrb.gmra.mxu3 %v2505_v2 }
 0x6de   : > { %3117 = shalt.err (!%p3114_p3)
}
 0x6df   : > { %s4500_s10 = smov 128   ;;  %s3256_s25 = smov 8  }
 0x6e0   : > { %3022 = dma.vmem_to_hbm [thread:$0]  (%p3380_p5), %s2740_s28, 256, %s2742_s27, %s4374_s4, %s4500_s10, %s4500_s10, %s3256_s25  }
 0x6e1   : > { %s2723_s5 = scalar_lea.hbm %s4477_s11, %s3009_s0  ;;  %s2725_s6 = sshll.u32 %s3431_s17, 4  ;;  %s2726_s6 = int_to_ptr.vmem [resolvable:$true] %s2725_s6 }
 0x6e2   : > { %s2727_s9 = sshll.u32 %s2723_s5, 4  ;;  %s2695_s3 = scalar_lea.sflag [#allocation9], %s3424_s22  ;;  %s2728_s9 = int_to_ptr.hbm [resolvable:$true] %s2727_s9 }
 0x6e3   : > { %s3132_s24 = sshra.s32 %s2728_s9, 4  ;;  %s3138_s28 = scalar_lea.hbm %s4477_s11, 16  ;;  %s3133_s24 = int_to_ptr.hbm [resolvable:$true] %s3132_s24 }
 0x6e4   : > { %s3134_s18 = scalar_lea.hbm %s3133_s24, 8  ;;  %p3139_p9 = scmp.lt.s32.totalorder %s3133_s24, %s4477_s11 }
 0x6e5   : > { %p3135_p4 = scmp.ne.s32.totalorder %s3133_s24, %s3134_s18  ;;  %p3140_p10 = scmp.lt.s32.totalorder %s3138_s28, %s3134_s18 }
 0x6e7   : > { %p3136_p7 = pnand %p3135_p4, %p3380_p5  ;;  %p3141_p11 = por %p3140_p10, %p3139_p9 }
 0x6e9   : > { %p3137_p8 = pneg %p3136_p7 }
 0x6eb   : > { %p3142_p12 = pnand %p3141_p11, %p3137_p8 }
 0x6ed   : > { %3145 = shalt.err (!%p3142_p12)
}
 0x6ee   : > { %3021 = dma.vmem_to_hbm [thread:$0]  (%p3380_p5), %s2726_s6, 128, %s2728_s9, %s2695_s3  }
 0x6ef   : > { %s2755_s7 = scalar_lea.hbm %s4479_s13, %s4365_s1  ;;  %s2756_s12 = sshll.u32 %s4126_s2, 4  ;;  %s2757_s12 = int_to_ptr.vmem [resolvable:$true] %s2756_s12 }
 0x6f0   : > { %s2758_s8 = sshll.u32 %s2755_s7, 4  ;;  %s3166_s19 = scalar_lea.hbm %s4479_s13, 32  ;;  %s2759_s8 = int_to_ptr.hbm [resolvable:$true] %s2758_s8 }
 0x6f1   : > { %s3160_s10 = sshra.s32 %s2759_s8, 4  ;;  %s3161_s10 = int_to_ptr.hbm [resolvable:$true] %s3160_s10 }
 0x6f2   : > { %s3162_s5 = scalar_lea.hbm %s3161_s10, 16  ;;  %p3167_p2 = scmp.lt.s32.totalorder %s3161_s10, %s4479_s13 }
 0x6f3   : > { %p3163_p13 = scmp.ne.s32.totalorder %s3161_s10, %s3162_s5  ;;  %p3168_p3 = scmp.lt.s32.totalorder %s3166_s19, %s3162_s5 }
 0x6f5   : > { %p3164_p0 = pnand %p3163_p13, %p3380_p5  ;;  %p3169_p4 = por %p3168_p3, %p3167_p2 }
 0x6f7   : > { %p3165_p1 = pneg %p3164_p0 }
 0x6f9   : > { %p3170_p7 = pnand %p3169_p4, %p3165_p1 }
 0x6fb   : > { %3173 = shalt.err (!%p3170_p7)
}
 0x6fc   : > { %s4548_s2 = smov 128   ;;  %s2772_s27 = scalar_lea.hbm %s4480_s14, %s4365_s1 }
 0x6fd   : > { %3023 = dma.vmem_to_hbm [thread:$0]  (%p3380_p5), %s2757_s12, 256, %s2759_s8, %s4374_s4, %s4548_s2, %s4548_s2, %s3256_s25  }
 0x6fe   : > { %s2773_s17 = sshll.u32 %s4318_s26, 4  ;;  %s2775_s0 = sshll.u32 %s2772_s27, 4  ;;  %s2774_s17 = int_to_ptr.vmem [resolvable:$true] %s2773_s17  ;;  %s2776_s0 = int_to_ptr.hbm [resolvable:$true] %s2775_s0 }
 0x6ff   : > { %s2710_s7 = scalar_lea.sflag [#allocation14], %s3424_s22  ;;  %s3188_s10 = sshra.s32 %s2776_s0, 4  ;;  %s3189_s10 = int_to_ptr.hbm [resolvable:$true] %s3188_s10 }
 0x700   : > { %s3190_s5 = scalar_lea.hbm %s3189_s10, 16  ;;  %s3194_s4 = scalar_lea.hbm %s4480_s14, 32 }
 0x701   : > { %p3191_p8 = scmp.ne.s32.totalorder %s3189_s10, %s3190_s5  ;;  %p3195_p11 = scmp.lt.s32.totalorder %s3189_s10, %s4480_s14 }
 0x702   : > { %p3196_p12 = scmp.lt.s32.totalorder %s3194_s4, %s3190_s5 }
 0x703   : > { %p3192_p9 = pnand %p3191_p8, %p3380_p5 }
 0x704   : > { %p3197_p13 = por %p3196_p12, %p3195_p11 }
 0x705   : > { %p3193_p10 = pneg %p3192_p9 }
 0x707   : > { %p3198_p0 = pnand %p3197_p13, %p3193_p10 }
 0x709   : > { %3201 = shalt.err (!%p3198_p0)
}
 0x70a   : > { %3024 = dma.vmem_to_hbm [thread:$0]  (%p3380_p5), %s2774_s17, 256, %s2776_s0, %s2710_s7, %s4548_s2, %s4548_s2, %s3256_s25   ;;  %v2474_v3 = vpop.permute.xlu2 %2473  ;;  %vm2692_vm2 = vcmask 155648  }
 0x70b   : > { %v2476_v32 = vperm.slane %v2474_v3, 0  ;;  %s524_s26 = scalar_lea.vmem %s4481_s15, %s3393_s16 }
 0x748   : > { %v2689_v50 = vpop.f32.mrf.mxu1 }
 0x74a   : > { %v2662_v24 = vpop.f32.mrf.mxu0 }
 0x74d   : > { %v2509_v29 = vpop.f32.mrf.mxu2 }
 0x74e   : > { %v2510_v52 = vadd.f32 %v2509_v29, %v2476_v32 }
 0x754   : > { %v2560_v44 = vpop.f32.mrf.mxu3 }
 0x755   : > { %v2561_v57 = vadd.f32 %v2560_v44, %v2510_v52 }
 0x759   : > { %v2594_v61 = vpop.f32.mrf.mxu2 }
 0x75a   : > { %v2595_v0 = vadd.f32 %v2594_v61, %v2561_v57 }
 0x760   : > { %v2623_v39 = vpop.f32.mrf.mxu3 }
 0x761   : > { %v2624_v54 = vadd.f32 %v2623_v39, %v2595_v0 }
 0x763   : > { %v2663_v33 = vadd.f32 %v2662_v24, %v2624_v54 }
 0x765   : > { %v2690_v53 = vadd.f32 %v2689_v50, %v2663_v33 }
 0x767   : > { %2693 = vst.msk [vmem:[%s524_s26] sm:$0x1] %vm2692_vm2, %v2690_v53 }
 0x768 PF: > { %p3042_p5 = scmp.ge.s32.totalorder %s3244_s23, 2  ;;  %s2793_s1 = sand.u32 1, %s3232_s20  }
 0x769   : > { %s2794_s25 = scalar_lea.sflag [#allocation9], %s2793_s1 }
 0x76a   : > { %p3030_p1 = pnand %p3042_p5, %p3384_p6 }
 0x76c   : > { %p3031_p2 = pneg %p3030_p1 }
 0x76e   : > { %3219 = dma.done.wait (%p3031_p2), %s2794_s25, 128  }
 0x76f   : > { %3221 = vsyncadd (%p3031_p2), %s2794_s25, 4294967168  ;;  %s4549_s19 = sadd.s32 4294967294, %s3244_s23  }
 0x770   : > { %s2803_s6 = sand.u32 1, %s4549_s19  }
 0x771   : > { %s2804_s9 = scalar_lea.sflag [#allocation11], %s2803_s6 }
 0x772   : > { %3223 = dma.done.wait (%p3031_p2), %s2804_s9, 512  }
 0x773   : > { %3225 = vsyncadd (%p3031_p2), %s2804_s9, 4294966784  ;;  %s2824_s16 = scalar_lea.sflag [#allocation14], %s2793_s1 }
 0x774   : > { %3227 = dma.done.wait (%p3031_p2), %s2824_s16, 256  }
 0x775   : > { %3229 = vsyncadd (%p3031_p2), %s2824_s16, 4294967040  ;;  %s4550_s23 = sld [smem:[#allocation19_spill]]  ;;  %s4553_s20 = smov %s3236_s21 }
 0x776   : > { %s4551_s2 = sld [smem:[#allocation18_spill]] }
 0x777   : > { %s4552_s22 = sld [smem:[#allocation20_spill]] }
 0x77b   : > { %p34_p3 = scmp.ge.s32.totalorder %s4550_s23, 4  }
 0x77c   : > { %s4554_s21 = smov %s4551_s2 }
 0x77d   :  { %36 = sbr.rel (!%p34_p3) target bundleno = 19 (0x13), region = 160 }
 0x782   :  { %2836 = vsyncpa [#allocation9], 1 }
 0x783   :  { %2838 = vsyncpa [#allocation9 + $0x1], 1 }
 0x784   :  { %2839 = vsyncpa [#allocation11], 1 }
 0x785   :  { %2841 = vsyncpa [#allocation11 + $0x1], 1 }
 0x786   :  { %2842 = vsyncpa [#allocation14], 1 }
 0x787   :  { %2844 = vsyncpa [#allocation14 + $0x1], 1 }

</bundles_post_ra>
